<compile_context>
chip_gen: v6e
topology: v6e:2x2x1
jax: 0.10.0
libtpu: 0.0.40
codegen_flags: <defaults>
</compile_context>

<pallas_src>
import functools

import jax
import jax.numpy as jnp
from jax.experimental import pallas as pl
from jax.experimental.pallas import tpu as pltpu

D_MODEL = 32
N_HEADS = 4
N_LEVELS = 3
N_POINTS = 4
LEAKY_SLOPE = 0.1
VMEM_LIMIT = 32 * 1024 * 1024  # safe on v5e/v6e/v7x (>= default on all gens)


# ---------------------------------------------------------------------------
# Pallas kernels
# ---------------------------------------------------------------------------
def _leaky(x, alpha):
    return jnp.where(x >= 0, x, alpha * x)


def _pick_row_tile(H, W, cap_rows=4096):
    """Largest divisor d of H whose row block (d*W output rows) is 8-aligned and
    at most `cap_rows`; prefers a single full-image tile for small frames so the
    kernel uses a static slice and the grid has the fewest steps."""
    best = None
    for d in range(1, H + 1):
        if H % d == 0 and (d * W) % 8 == 0 and d * W <= cap_rows:
            best = d
    return best if best is not None else H


def conv3x3_pallas(x, w, bias, *, dilation=1, alpha=None,
                   residual=None, post_w=None, post_b=None, post_alpha=None,
                   im2col=True):
    """3x3 conv (stride 1, padding == dilation) with a fused per-pixel epilogue.

        y = conv3x3(x) + bias
        if alpha      is not None: y = leaky_relu(y, alpha)
        if residual   is not None: y = y + residual
        if post_w     is not None: y = y @ post_w + post_b      (1x1 conv)
        if post_alpha is not None: y = leaky_relu(y, post_alpha)

    x: (B,H,W,Cin) NHWC, w: (3,3,Cin,Cout) HWIO.  Returns (B,H,W,Cfinal).
    """
    B, H, W, Cin = x.shape
    KH, KW, _, Cout = w.shape
    pad = dilation
    xp = jnp.pad(x, ((0, 0), (pad, pad), (pad, pad), (0, 0)))
    Hp, Wp = H + 2 * pad, W + 2 * pad

    has_res = residual is not None
    has_post = post_w is not None
    Cfin = post_w.shape[1] if has_post else Cout

    row_tile = _pick_row_tile(H, W)
    n_row_tiles = H // row_tile
    rows = row_tile * W

    if im2col:
        w_in = w.reshape(KH * KW * Cin, Cout)          # single K = 9*Cin matmul
        w_spec = pl.BlockSpec((KH * KW * Cin, Cout), lambda bi, ri: (0, 0))
    else:
        w_in = w.reshape(KH * KW, Cin, Cout)           # per-tap fallback
        w_spec = pl.BlockSpec((KH * KW, Cin, Cout), lambda bi, ri: (0, 0, 0))

    inputs = [xp, w_in, bias.reshape(1, Cout)]
    in_specs = [
        # Full padded image per batch; the block index ignores the row-tile axis
        # so it is DMA'd once per batch and reused across row tiles.
        # TODO(synk): for very large H*W, stream halo'd row windows with a manual
        # make_async_copy double-buffer instead of whole-image blocks.
        pl.BlockSpec((None, Hp, Wp, Cin), lambda bi, ri: (bi, 0, 0, 0)),
        w_spec,
        pl.BlockSpec((1, Cout), lambda bi, ri: (0, 0)),
    ]
    if has_res:
        inputs.append(residual.reshape(B, H * W, Cout))
        in_specs.append(pl.BlockSpec((None, rows, Cout), lambda bi, ri: (bi, ri, 0)))
    if has_post:
        inputs.extend([post_w, post_b.reshape(1, Cfin)])
        in_specs.extend([pl.BlockSpec((Cout, Cfin), lambda bi, ri: (0, 0)),
                         pl.BlockSpec((1, Cfin), lambda bi, ri: (0, 0))])

    def kernel(*refs):
        x_ref, w_ref, b_ref = refs[:3]
        i = 3
        res_ref = pw_ref = pb_ref = None
        if has_res:
            res_ref = refs[i]; i += 1
        if has_post:
            pw_ref, pb_ref = refs[i], refs[i + 1]; i += 2
        o_ref = refs[i]

        if n_row_tiles == 1:
            xb = x_ref[...]                                  # static whole-image path
        else:
            ri = pl.program_id(1)
            row0 = pl.multiple_of(ri * row_tile, row_tile)
            xb = x_ref[pl.ds(row0, row_tile + 2 * pad), :, :]  # (rt+2p, Wp, Cin)

        taps = []
        for dy in range(KH):
            for dx in range(KW):
                oy, ox = dy * dilation, dx * dilation
                taps.append(xb[oy:oy + row_tile, ox:ox + W, :].reshape(rows, Cin))

        if im2col:
            patches = jnp.concatenate(taps, axis=-1)        # (rows, 9*Cin)
            acc = jnp.dot(patches, w_ref[...],
                          preferred_element_type=jnp.float32)
        else:
            acc = jnp.zeros((rows, Cout), jnp.float32)
            for t, tap in enumerate(taps):
                acc = acc + jnp.dot(tap, w_ref[t],
                                    preferred_element_type=jnp.float32)

        acc = acc + b_ref[...]
        if alpha is not None:
            acc = _leaky(acc, alpha)
        if has_res:
            acc = acc + res_ref[...]
        if has_post:
            acc = jnp.dot(acc, pw_ref[...],
                          preferred_element_type=jnp.float32) + pb_ref[...]
            if post_alpha is not None:
                acc = _leaky(acc, post_alpha)
        o_ref[...] = acc

    out = pl.pallas_call(
        kernel,
        out_shape=jax.ShapeDtypeStruct((B, H * W, Cfin), jnp.float32),
        grid=(B, n_row_tiles),
        in_specs=in_specs,
        out_specs=pl.BlockSpec((None, rows, Cfin), lambda bi, ri: (bi, ri, 0)),
        compiler_params=pltpu.CompilerParams(
            dimension_semantics=("parallel", "parallel"),
            vmem_limit_bytes=VMEM_LIMIT),
    )(*inputs)
    return out.reshape(B, H, W, Cfin)


def _pick_hw_tile(HW, cap=2048):
    """Single full tile when small (fewest grid steps); otherwise the largest
    8-aligned divisor of HW not exceeding `cap`."""
    if HW <= cap:
        return HW
    best = None
    for cand in range(8, cap + 1, 8):
        if HW % cand == 0:
            best = cand
    return best if best is not None else HW


def attn_agg_pallas(logits, sampled, w_out, b_out):
    """Deformable-attention per-head softmax + weighted aggregation + out proj.

    logits : (B, HW, heads*L*P)         lane-dense, minor order (h, l, p)
    sampled: (B, HW, heads*L*P*D)       lane-dense, minor order (h, l, p, d)
    w_out  : (heads*D, heads*D), b_out: (heads*D,)
    returns: (B, HW, heads*D)

    Everything stays in (rows, lanes) layout; all reductions are MXU matmuls:
      * per-head softmax denominator: e @ Sh   (Sh = block-of-ones head mask)
      * lane replication of weights : attw @ R (0/1 repeat matrix)
      * (l,p)-sum + output proj     : (attw_rep * sampled) @ Wbig, K = 384
    The row max (shared across heads) is used for exp stabilisation; softmax is
    invariant to the choice of max, so the result matches per-head softmax.
    """
    B, HW, HLP = logits.shape
    KD = sampled.shape[-1]
    D = KD // HLP
    C = w_out.shape[-1]
    Hn = C // D
    LP = HLP // Hn

    head_id = jnp.arange(HLP, dtype=jnp.int32) // LP
    Sh = (head_id[:, None] == head_id[None, :]).astype(jnp.float32)      # (HLP,HLP)
    R = jnp.repeat(jnp.eye(HLP, dtype=jnp.float32), D, axis=1)           # (HLP,KD)
    Wbig = jnp.broadcast_to(w_out.reshape(Hn, 1, D, C),
                            (Hn, LP, D, C)).reshape(KD, C)               # (KD,C)
    bias2 = b_out.reshape(1, C)

    hw_tile = _pick_hw_tile(HW)
    grid = (B, HW // hw_tile)

    def kernel(l_ref, s_ref, sh_ref, r_ref, wb_ref, b_ref, o_ref):
        lg = l_ref[...]                                     # (T, HLP) lane-dense
        m = jnp.max(lg, axis=-1, keepdims=True)             # row max (softmax-invariant)
        e = jnp.exp(lg - m)
        denom = jnp.dot(e, sh_ref[...],
                        preferred_element_type=jnp.float32)  # per-head sums, replicated
        attw = e / jnp.maximum(denom, 1e-20)                 # per-head softmax
        attw_rep = jnp.dot(attw, r_ref[...],
                           preferred_element_type=jnp.float32)   # (T, KD)
        weighted = attw_rep * s_ref[...]                     # lane-dense multiply
        out = jnp.dot(weighted, wb_ref[...],
                      preferred_element_type=jnp.float32)    # fused (l,p)-sum + oproj
        o_ref[...] = out + b_ref[...]

    return pl.pallas_call(
        kernel,
        out_shape=jax.ShapeDtypeStruct((B, HW, C), jnp.float32),
        grid=grid,
        in_specs=[
            pl.BlockSpec((None, hw_tile, HLP), lambda i, j: (i, j, 0)),
            pl.BlockSpec((None, hw_tile, KD), lambda i, j: (i, j, 0)),
            pl.BlockSpec((HLP, HLP), lambda i, j: (0, 0)),
            pl.BlockSpec((HLP, KD), lambda i, j: (0, 0)),
            pl.BlockSpec((KD, C), lambda i, j: (0, 0)),
            pl.BlockSpec((1, C), lambda i, j: (0, 0)),
        ],
        out_specs=pl.BlockSpec((None, hw_tile, C), lambda i, j: (i, j, 0)),
        compiler_params=pltpu.CompilerParams(
            dimension_semantics=("parallel", "parallel"),
            vmem_limit_bytes=VMEM_LIMIT),
    )(logits, sampled, Sh, R, Wbig, bias2)


# ---------------------------------------------------------------------------
# Plain-JAX glue (gather-heavy sampling)
# ---------------------------------------------------------------------------
def warp_jax(x, flo):
    """grid_sample(x, grid+flow), bilinear, padding_mode='border',
    align_corners=True. x: (B,C,H,W), flo: (B,2,H,W)."""
    b, c, h, w = x.shape
    xs = jnp.transpose(x, (0, 2, 3, 1))                      # NHWC
    xx = jnp.arange(w, dtype=jnp.float32)[None, None, :]
    yy = jnp.arange(h, dtype=jnp.float32)[None, :, None]
    vx = jnp.clip(xx + flo[:, 0], 0.0, w - 1.0)
    vy = jnp.clip(yy + flo[:, 1], 0.0, h - 1.0)
    x0, y0 = jnp.floor(vx), jnp.floor(vy)
    x1 = jnp.minimum(x0 + 1.0, w - 1.0)
    y1 = jnp.minimum(y0 + 1.0, h - 1.0)
    wx1, wy1 = vx - x0, vy - y0
    wx0, wy0 = 1.0 - wx1, 1.0 - wy1
    x0i, x1i = x0.astype(jnp.int32), x1.astype(jnp.int32)
    y0i, y1i = y0.astype(jnp.int32), y1.astype(jnp.int32)
    bi = jnp.arange(b)[:, None, None]

    def g(yi, xi):
        return xs[bi, yi, xi]                                # (B, H, W, C)

    out = (g(y0i, x0i) * (wx0 * wy0)[..., None]
           + g(y0i, x1i) * (wx1 * wy0)[..., None]
           + g(y1i, x0i) * (wx0 * wy1)[..., None]
           + g(y1i, x1i) * (wx1 * wy1)[..., None])
    return jnp.transpose(out, (0, 3, 1, 2))


def ms_deform_sample(value, loc):
    """MS-deformable-attention bilinear sampling (zeros padding,
    align_corners=False).
    value: (B, L, H, W, heads, D); loc: (B, HW, heads, L, P, 2) in [0, 1].
    returns (B, HW, heads, L, P, D)."""
    b, L, h, w, heads, D = value.shape
    x = loc[..., 0] * w - 0.5
    y = loc[..., 1] * h - 0.5
    x0, y0 = jnp.floor(x), jnp.floor(y)
    x1, y1 = x0 + 1.0, y0 + 1.0
    wx1, wy1 = x - x0, y - y0
    wx0, wy0 = 1.0 - wx1, 1.0 - wy1
    bi = jnp.arange(b)[:, None, None, None, None]
    li = jnp.arange(L)[None, None, None, :, None]
    hi = jnp.arange(heads)[None, None, :, None, None]

    def g(yi, xi):
        valid = (xi >= 0) & (xi <= w - 1) & (yi >= 0) & (yi <= h - 1)
        xc = jnp.clip(xi, 0, w - 1).astype(jnp.int32)
        yc = jnp.clip(yi, 0, h - 1).astype(jnp.int32)
        vals = value[bi, li, yc, xc, hi]                     # (B,HW,heads,L,P,D)
        return vals * valid[..., None].astype(value.dtype)

    return (g(y0, x0) * (wx0 * wy0)[..., None]
            + g(y0, x1) * (wx1 * wy0)[..., None]
            + g(y1, x0) * (wx0 * wy1)[..., None]
            + g(y1, x1) * (wx1 * wy1)[..., None])


# ---------------------------------------------------------------------------
# Parameters + forward
# ---------------------------------------------------------------------------
def init_params(key, c=D_MODEL, heads=N_HEADS, levels=N_LEVELS, points=N_POINTS):
    ks = iter(jax.random.split(key, 32))

    def w(shape, scale=0.05):
        return jax.random.normal(next(ks), shape, jnp.float32) * scale

    return {
        "emb_qk_w": w((3, 3, 3 * c + 4, 3 * c)), "emb_qk_b": w((3 * c,), 0.01),
        "emb_v_w": w((3, 3, 3 * c, 3 * c)), "emb_v_b": w((3 * c,), 0.01),
        "off_w": w((3 * c, heads * levels * points * 2)),
        "off_b": w((heads * levels * points * 2,), 0.01),
        "attn_w": w((3 * c, heads * levels * points)),
        "attn_b": w((heads * levels * points,), 0.01),
        "vproj_w": w((c, c)), "vproj_b": w((c,), 0.01),
        "oproj_w": w((c, c)), "oproj_b": w((c,), 0.01),
        "ffn_w": w((3, 3, c, c)), "ffn_b": w((c,), 0.01),
        "ffwd0_w": w((3, 3, 2 * c, c)), "ffwd0_b": w((c,), 0.01),
        "ffwd1_w": w((3, 3, c, c)), "ffwd1_b": w((c,), 0.01),
        "fusion_w": w((c, c)), "fusion_b": w((c,), 0.01),
    }


def deformable_attn_block_fusion(params, frame, srcframe, flow_forward,
                                 flow_backward, use_im2col=True):
    b, t, c, h, w = frame.shape
    hw = h * w
    heads, L, P = N_HEADS, N_LEVELS, N_POINTS
    D = c // heads
    conv = functools.partial(conv3x3_pallas, im2col=use_im2col)

    # warp neighbouring frames to the centre frame (plain-JAX gather)
    warp01 = warp_jax(frame[:, 0], flow_backward[:, 0])          # (b,c,h,w)
    warp21 = warp_jax(frame[:, 2], flow_forward[:, 1])

    # emb_qk conv + LeakyReLU fused with the offset / attention projections
    qk_in = jnp.concatenate(
        [warp01, frame[:, 1], warp21, flow_forward[:, 1], flow_backward[:, 0]],
        axis=1)                                                  # (b, 3c+4, h, w)
    qk_in = jnp.transpose(qk_in, (0, 2, 3, 1))                   # NHWC
    n_off = heads * L * P * 2
    w_qcat = jnp.concatenate([params["off_w"], params["attn_w"]], axis=1)
    b_qcat = jnp.concatenate([params["off_b"], params["attn_b"]], axis=0)
    qproj = conv(qk_in, params["emb_qk_w"], params["emb_qk_b"], dilation=1,
                 alpha=LEAKY_SLOPE, post_w=w_qcat, post_b=b_qcat)  # (b,h,w,144)
    qproj = qproj.reshape(b, hw, n_off + heads * L * P)
    off = qproj[..., :n_off].reshape(b, hw, heads, L, P, 2)
    attn_logits = qproj[..., n_off:]                             # (b,hw,heads*L*P)

    # emb_v conv + LeakyReLU fused with the per-frame (block-diag) value proj
    v_in = jnp.transpose(frame.reshape(b, t * c, h, w), (0, 2, 3, 1))
    w_vbd = jnp.kron(jnp.eye(t, dtype=jnp.float32), params["vproj_w"])  # (3c,3c)
    b_vbd = jnp.tile(params["vproj_b"], t)
    v_proj = conv(v_in, params["emb_v_w"], params["emb_v_b"], dilation=1,
                  alpha=LEAKY_SLOPE, post_w=w_vbd, post_b=b_vbd)    # (b,h,w,3c)
    v_proj = (v_proj.reshape(b, hw, L, heads, D)
              .transpose(0, 2, 1, 3, 4).reshape(b, L, h, w, heads, D))

    # ---- MSDeformAttn_Fusion ----
    # TODO(synk): MSDeformAttn_Fusion source was not provided with the module;
    # this follows the STDAN design (query = per-pixel concat over t, value =
    # per-frame levels, flow_backward / zero / flow_forward added to the
    # sampling offsets of the corresponding level).
    ref_x = (jnp.arange(w, dtype=jnp.float32) + 0.5) / w
    ref_y = (jnp.arange(h, dtype=jnp.float32) + 0.5) / h
    ry, rx = jnp.meshgrid(ref_y, ref_x, indexing="ij")
    ref = jnp.stack([rx.reshape(-1), ry.reshape(-1)], axis=-1)   # (hw, 2)

    zeros = jnp.zeros_like(flow_forward[:, 1])
    flow_lvls = jnp.stack([flow_backward[:, 0], zeros, flow_forward[:, 1]], 1)
    flow_lvls = flow_lvls.transpose(0, 3, 4, 1, 2).reshape(b, hw, L, 2)

    norm = jnp.array([w, h], dtype=jnp.float32)
    loc = (ref[None, :, None, None, None, :]
           + (off + flow_lvls[:, :, None, :, None, :]) / norm)   # (b,hw,heads,L,P,2)

    # TODO(synk): the deformable bilinear sampling is a data-dependent gather
    # and stays in plain JAX; a Pallas scalar-prefetch gather fused with the
    # aggregation kernel would avoid materializing `sampled` in HBM.
    sampled = ms_deform_sample(v_proj, loc)                      # (b,hw,heads,L,P,D)
    sampled = sampled.reshape(b, hw, heads * L * P * D)          # lane-dense (384)

    attn_out = attn_agg_pallas(attn_logits, sampled,
                               params["oproj_w"], params["oproj_b"])  # (b,hw,c)
    attn_out = attn_out.reshape(b, h, w, c)

    # feed_forward conv fused with the centre-frame residual
    frame1 = jnp.transpose(frame[:, 1], (0, 2, 3, 1))
    out = conv(attn_out, params["ffn_w"], params["ffn_b"], dilation=1,
               alpha=None, residual=frame1)                      # (b,h,w,c)

    # dilated feedforward branch; 2nd conv fused with residual + 1x1 fusion
    src1 = jnp.transpose(srcframe[:, 1], (0, 2, 3, 1))
    tseq = jnp.concatenate([out, src1], axis=-1)                 # (b,h,w,2c)
    ffw = conv(tseq, params["ffwd0_w"], params["ffwd0_b"], dilation=2,
               alpha=LEAKY_SLOPE)
    out = conv(ffw, params["ffwd1_w"], params["ffwd1_b"], dilation=1,
               alpha=None, residual=out,
               post_w=params["fusion_w"], post_b=params["fusion_b"],
               post_alpha=LEAKY_SLOPE)                           # (b,h,w,c)
    return jnp.transpose(out, (0, 3, 1, 2))                      # NCHW (b,c,h,w)


if __name__ == "__main__":
    key = jax.random.PRNGKey(0)
    kf, ks, kff, kfb = jax.random.split(key, 4)
    b, t, c, h, w = 2, 3, D_MODEL, 16, 16
    frame = jax.random.normal(kf, (b, t, c, h, w), jnp.float32)
    srcframe = jax.random.normal(ks, (b, t, c, h, w), jnp.float32)
    flow_forward = jax.random.normal(kff, (b, 2, 2, h, w), jnp.float32) * 1.5
    flow_backward = jax.random.normal(kfb, (b, 2, 2, h, w), jnp.float32) * 1.5
    params = init_params(jax.random.PRNGKey(42))

    try:
        fwd = jax.jit(functools.partial(deformable_attn_block_fusion,
                                        use_im2col=True))
        out = jax.block_until_ready(
            fwd(params, frame, srcframe, flow_forward, flow_backward))
    except Exception:
        # Fallback: per-tap matmul conv (no in-kernel lane concatenation).
        fwd = jax.jit(functools.partial(deformable_attn_block_fusion,
                                        use_im2col=False))
        out = jax.block_until_ready(
            fwd(params, frame, srcframe, flow_forward, flow_backward))

    assert out.shape == (b, c, h, w) and out.dtype == jnp.float32
    print("KERNEL_OK")
</pallas_src>

<mosaic_0001>
module attributes {stable_mosaic.version = 11 : i64} {
  func.func @kernel(%arg0: i32, %arg1: i32, %arg2: memref<1x18x18x100xf32, #tpu.memory_space<vmem>>, %arg3: memref<900x96xf32, #tpu.memory_space<vmem>>, %arg4: memref<1x96xf32, #tpu.memory_space<vmem>>, %arg5: memref<96x144xf32, #tpu.memory_space<vmem>>, %arg6: memref<1x144xf32, #tpu.memory_space<vmem>>, %arg7: memref<1x256x144xf32, #tpu.memory_space<vmem>>) attributes {dimension_semantics = [#tpu.dimension_semantics<parallel>, #tpu.dimension_semantics<parallel>], iteration_bounds = array<i64: 2, 1>, scalar_prefetch = 0 : i64, scratch_operands = 0 : i64, tpu.core_type = #tpu.core_type<tc>, window_params = [{transform_indices = @transform_0, window_bounds = array<i64: 1, 18, 18, 100>}, {pipeline_mode = #tpu.pipeline_mode<synchronous>, transform_indices = @transform_1, window_bounds = array<i64: 900, 96>}, {pipeline_mode = #tpu.pipeline_mode<synchronous>, transform_indices = @transform_2, window_bounds = array<i64: 1, 96>}, {pipeline_mode = #tpu.pipeline_mode<synchronous>, transform_indices = @transform_3, window_bounds = array<i64: 96, 144>}, {pipeline_mode = #tpu.pipeline_mode<synchronous>, transform_indices = @transform_4, window_bounds = array<i64: 1, 144>}, {transform_indices = @transform_5, window_bounds = array<i64: 1, 256, 144>}]} {
    %c0 = arith.constant 0 : index
    %c0_0 = arith.constant 0 : index
    %c0_1 = arith.constant 0 : index
    %c0_2 = arith.constant 0 : index
    %0 = vector.load %arg2[%c0, %c0_0, %c0_1, %c0_2] : memref<1x18x18x100xf32, #tpu.memory_space<vmem>>, vector<1x18x18x100xf32>
    %1 = vector.shape_cast %0 : vector<1x18x18x100xf32> to vector<18x18x100xf32>
    %2 = vector.extract_strided_slice %1 {offsets = [0, 0, 0], sizes = [16, 16, 100], strides = [1, 1, 1]} : vector<18x18x100xf32> to vector<16x16x100xf32>
    %3 = vector.shape_cast %2 : vector<16x16x100xf32> to vector<256x100xf32>
    %4 = vector.extract_strided_slice %1 {offsets = [0, 1, 0], sizes = [16, 16, 100], strides = [1, 1, 1]} : vector<18x18x100xf32> to vector<16x16x100xf32>
    %5 = vector.shape_cast %4 : vector<16x16x100xf32> to vector<256x100xf32>
    %6 = vector.extract_strided_slice %1 {offsets = [0, 2, 0], sizes = [16, 16, 100], strides = [1, 1, 1]} : vector<18x18x100xf32> to vector<16x16x100xf32>
    %7 = vector.shape_cast %6 : vector<16x16x100xf32> to vector<256x100xf32>
    %8 = vector.extract_strided_slice %1 {offsets = [1, 0, 0], sizes = [16, 16, 100], strides = [1, 1, 1]} : vector<18x18x100xf32> to vector<16x16x100xf32>
    %9 = vector.shape_cast %8 : vector<16x16x100xf32> to vector<256x100xf32>
    %10 = vector.extract_strided_slice %1 {offsets = [1, 1, 0], sizes = [16, 16, 100], strides = [1, 1, 1]} : vector<18x18x100xf32> to vector<16x16x100xf32>
    %11 = vector.shape_cast %10 : vector<16x16x100xf32> to vector<256x100xf32>
    %12 = vector.extract_strided_slice %1 {offsets = [1, 2, 0], sizes = [16, 16, 100], strides = [1, 1, 1]} : vector<18x18x100xf32> to vector<16x16x100xf32>
    %13 = vector.shape_cast %12 : vector<16x16x100xf32> to vector<256x100xf32>
    %14 = vector.extract_strided_slice %1 {offsets = [2, 0, 0], sizes = [16, 16, 100], strides = [1, 1, 1]} : vector<18x18x100xf32> to vector<16x16x100xf32>
    %15 = vector.shape_cast %14 : vector<16x16x100xf32> to vector<256x100xf32>
    %16 = vector.extract_strided_slice %1 {offsets = [2, 1, 0], sizes = [16, 16, 100], strides = [1, 1, 1]} : vector<18x18x100xf32> to vector<16x16x100xf32>
    %17 = vector.shape_cast %16 : vector<16x16x100xf32> to vector<256x100xf32>
    %18 = vector.extract_strided_slice %1 {offsets = [2, 2, 0], sizes = [16, 16, 100], strides = [1, 1, 1]} : vector<18x18x100xf32> to vector<16x16x100xf32>
    %19 = vector.shape_cast %18 : vector<16x16x100xf32> to vector<256x100xf32>
    %20 = tpu.concatenate %3, %5, %7, %9, %11, %13, %15, %17, %19 in 1 : vector<256x100xf32>, vector<256x100xf32>, vector<256x100xf32>, vector<256x100xf32>, vector<256x100xf32>, vector<256x100xf32>, vector<256x100xf32>, vector<256x100xf32>, vector<256x100xf32> -> vector<256x900xf32>
    %c0_3 = arith.constant 0 : index
    %c0_4 = arith.constant 0 : index
    %21 = vector.load %arg3[%c0_3, %c0_4] : memref<900x96xf32, #tpu.memory_space<vmem>>, vector<900x96xf32>
    %cst = arith.constant dense<0.000000e+00> : vector<256x96xf32>
    %22 = tpu.matmul %20, %21, %cst {dimension_numbers = #tpu.dot_dimension_numbers<[1], [0], [0], [1], [0, 0, 1, 1], [], []>} : vector<256x900xf32>, vector<900x96xf32>, vector<256x96xf32> -> vector<256x96xf32>
    %c0_5 = arith.constant 0 : index
    %c0_6 = arith.constant 0 : index
    %23 = vector.load %arg4[%c0_5, %c0_6] : memref<1x96xf32, #tpu.memory_space<vmem>>, vector<1x96xf32>
    %24 = vector.broadcast %23 : vector<1x96xf32> to vector<256x96xf32>
    %25 = arith.addf %22, %24 : vector<256x96xf32>
    %cst_7 = arith.constant 0.000000e+00 : f32
    %26 = vector.broadcast %cst_7 : f32 to vector<256x96xf32>
    %27 = arith.cmpf oge, %25, %26 : vector<256x96xf32>
    %cst_8 = arith.constant 1.000000e-01 : f32
    %28 = vector.broadcast %cst_8 : f32 to vector<256x96xf32>
    %29 = arith.mulf %28, %25 : vector<256x96xf32>
    %30 = arith.select %27, %25, %29 : vector<256x96xi1>, vector<256x96xf32>
    %c0_9 = arith.constant 0 : index
    %c0_10 = arith.constant 0 : index
    %31 = vector.load %arg5[%c0_9, %c0_10] : memref<96x144xf32, #tpu.memory_space<vmem>>, vector<96x144xf32>
    %cst_11 = arith.constant dense<0.000000e+00> : vector<256x144xf32>
    %32 = tpu.matmul %30, %31, %cst_11 {dimension_numbers = #tpu.dot_dimension_numbers<[1], [0], [0], [1], [0, 0, 1, 1], [], []>} : vector<256x96xf32>, vector<96x144xf32>, vector<256x144xf32> -> vector<256x144xf32>
    %c0_12 = arith.constant 0 : index
    %c0_13 = arith.constant 0 : index
    %33 = vector.load %arg6[%c0_12, %c0_13] : memref<1x144xf32, #tpu.memory_space<vmem>>, vector<1x144xf32>
    %34 = vector.broadcast %33 : vector<1x144xf32> to vector<256x144xf32>
    %35 = arith.addf %32, %34 : vector<256x144xf32>
    %c0_14 = arith.constant 0 : index
    %c0_15 = arith.constant 0 : index
    %c0_16 = arith.constant 0 : index
    %36 = vector.load %arg7[%c0_14, %c0_15, %c0_16] : memref<1x256x144xf32, #tpu.memory_space<vmem>>, vector<1x256x144xf32>
    %37 = vector.shape_cast %36 : vector<1x256x144xf32> to vector<256x144xf32>
    %38 = vector.shape_cast %35 : vector<256x144xf32> to vector<1x256x144xf32>
    tpu.vector_store %arg7[%c0_14, %c0_15, %c0_16], %38 {strides = array<i32>} : memref<1x256x144xf32, #tpu.memory_space<vmem>>, vector<1x256x144xf32>,
    return
  }
  func.func @transform_0(%arg0: i32, %arg1: i32) -> (i32, i32, i32, i32) {
    %c0_i32 = arith.constant 0 : i32
    %c0_i32_0 = arith.constant 0 : i32
    %c0_i32_1 = arith.constant 0 : i32
    %c0_i32_2 = arith.constant 0 : i32
    return %arg0, %c0_i32, %c0_i32_0, %c0_i32_1 : i32, i32, i32, i32
  }
  func.func @transform_1(%arg0: i32, %arg1: i32) -> (i32, i32) {
    %c0_i32 = arith.constant 0 : i32
    %c0_i32_0 = arith.constant 0 : i32
    %c0_i32_1 = arith.constant 0 : i32
    return %c0_i32, %c0_i32_0 : i32, i32
  }
  func.func @transform_2(%arg0: i32, %arg1: i32) -> (i32, i32) {
    %c0_i32 = arith.constant 0 : i32
    %c0_i32_0 = arith.constant 0 : i32
    %c0_i32_1 = arith.constant 0 : i32
    return %c0_i32, %c0_i32_0 : i32, i32
  }
  func.func @transform_3(%arg0: i32, %arg1: i32) -> (i32, i32) {
    %c0_i32 = arith.constant 0 : i32
    %c0_i32_0 = arith.constant 0 : i32
    %c0_i32_1 = arith.constant 0 : i32
    return %c0_i32, %c0_i32_0 : i32, i32
  }
  func.func @transform_4(%arg0: i32, %arg1: i32) -> (i32, i32) {
    %c0_i32 = arith.constant 0 : i32
    %c0_i32_0 = arith.constant 0 : i32
    %c0_i32_1 = arith.constant 0 : i32
    return %c0_i32, %c0_i32_0 : i32, i32
  }
  func.func @transform_5(%arg0: i32, %arg1: i32) -> (i32, i32, i32) {
    %c0_i32 = arith.constant 0 : i32
    %c0_i32_0 = arith.constant 0 : i32
    return %arg0, %arg1, %c0_i32 : i32, i32, i32
  }
}

module attributes {stable_mosaic.version = 11 : i64} {
  func.func @kernel(%arg0: i32, %arg1: i32, %arg2: memref<1x18x18x96xf32, #tpu.memory_space<vmem>>, %arg3: memref<864x96xf32, #tpu.memory_space<vmem>>, %arg4: memref<1x96xf32, #tpu.memory_space<vmem>>, %arg5: memref<96x96xf32, #tpu.memory_space<vmem>>, %arg6: memref<1x96xf32, #tpu.memory_space<vmem>>, %arg7: memref<1x256x96xf32, #tpu.memory_space<vmem>>) attributes {dimension_semantics = [#tpu.dimension_semantics<parallel>, #tpu.dimension_semantics<parallel>], iteration_bounds = array<i64: 2, 1>, scalar_prefetch = 0 : i64, scratch_operands = 0 : i64, tpu.core_type = #tpu.core_type<tc>, window_params = [{transform_indices = @transform_0, window_bounds = array<i64: 1, 18, 18, 96>}, {pipeline_mode = #tpu.pipeline_mode<synchronous>, transform_indices = @transform_1, window_bounds = array<i64: 864, 96>}, {pipeline_mode = #tpu.pipeline_mode<synchronous>, transform_indices = @transform_2, window_bounds = array<i64: 1, 96>}, {pipeline_mode = #tpu.pipeline_mode<synchronous>, transform_indices = @transform_3, window_bounds = array<i64: 96, 96>}, {pipeline_mode = #tpu.pipeline_mode<synchronous>, transform_indices = @transform_4, window_bounds = array<i64: 1, 96>}, {transform_indices = @transform_5, window_bounds = array<i64: 1, 256, 96>}]} {
    %c0 = arith.constant 0 : index
    %c0_0 = arith.constant 0 : index
    %c0_1 = arith.constant 0 : index
    %c0_2 = arith.constant 0 : index
    %0 = vector.load %arg2[%c0, %c0_0, %c0_1, %c0_2] : memref<1x18x18x96xf32, #tpu.memory_space<vmem>>, vector<1x18x18x96xf32>
    %1 = vector.shape_cast %0 : vector<1x18x18x96xf32> to vector<18x18x96xf32>
    %2 = vector.extract_strided_slice %1 {offsets = [0, 0, 0], sizes = [16, 16, 96], strides = [1, 1, 1]} : vector<18x18x96xf32> to vector<16x16x96xf32>
    %3 = vector.shape_cast %2 : vector<16x16x96xf32> to vector<256x96xf32>
    %4 = vector.extract_strided_slice %1 {offsets = [0, 1, 0], sizes = [16, 16, 96], strides = [1, 1, 1]} : vector<18x18x96xf32> to vector<16x16x96xf32>
    %5 = vector.shape_cast %4 : vector<16x16x96xf32> to vector<256x96xf32>
    %6 = vector.extract_strided_slice %1 {offsets = [0, 2, 0], sizes = [16, 16, 96], strides = [1, 1, 1]} : vector<18x18x96xf32> to vector<16x16x96xf32>
    %7 = vector.shape_cast %6 : vector<16x16x96xf32> to vector<256x96xf32>
    %8 = vector.extract_strided_slice %1 {offsets = [1, 0, 0], sizes = [16, 16, 96], strides = [1, 1, 1]} : vector<18x18x96xf32> to vector<16x16x96xf32>
    %9 = vector.shape_cast %8 : vector<16x16x96xf32> to vector<256x96xf32>
    %10 = vector.extract_strided_slice %1 {offsets = [1, 1, 0], sizes = [16, 16, 96], strides = [1, 1, 1]} : vector<18x18x96xf32> to vector<16x16x96xf32>
    %11 = vector.shape_cast %10 : vector<16x16x96xf32> to vector<256x96xf32>
    %12 = vector.extract_strided_slice %1 {offsets = [1, 2, 0], sizes = [16, 16, 96], strides = [1, 1, 1]} : vector<18x18x96xf32> to vector<16x16x96xf32>
    %13 = vector.shape_cast %12 : vector<16x16x96xf32> to vector<256x96xf32>
    %14 = vector.extract_strided_slice %1 {offsets = [2, 0, 0], sizes = [16, 16, 96], strides = [1, 1, 1]} : vector<18x18x96xf32> to vector<16x16x96xf32>
    %15 = vector.shape_cast %14 : vector<16x16x96xf32> to vector<256x96xf32>
    %16 = vector.extract_strided_slice %1 {offsets = [2, 1, 0], sizes = [16, 16, 96], strides = [1, 1, 1]} : vector<18x18x96xf32> to vector<16x16x96xf32>
    %17 = vector.shape_cast %16 : vector<16x16x96xf32> to vector<256x96xf32>
    %18 = vector.extract_strided_slice %1 {offsets = [2, 2, 0], sizes = [16, 16, 96], strides = [1, 1, 1]} : vector<18x18x96xf32> to vector<16x16x96xf32>
    %19 = vector.shape_cast %18 : vector<16x16x96xf32> to vector<256x96xf32>
    %20 = tpu.concatenate %3, %5, %7, %9, %11, %13, %15, %17, %19 in 1 : vector<256x96xf32>, vector<256x96xf32>, vector<256x96xf32>, vector<256x96xf32>, vector<256x96xf32>, vector<256x96xf32>, vector<256x96xf32>, vector<256x96xf32>, vector<256x96xf32> -> vector<256x864xf32>
    %c0_3 = arith.constant 0 : index
    %c0_4 = arith.constant 0 : index
    %21 = vector.load %arg3[%c0_3, %c0_4] : memref<864x96xf32, #tpu.memory_space<vmem>>, vector<864x96xf32>
    %cst = arith.constant dense<0.000000e+00> : vector<256x96xf32>
    %22 = tpu.matmul %20, %21, %cst {dimension_numbers = #tpu.dot_dimension_numbers<[1], [0], [0], [1], [0, 0, 1, 1], [], []>} : vector<256x864xf32>, vector<864x96xf32>, vector<256x96xf32> -> vector<256x96xf32>
    %c0_5 = arith.constant 0 : index
    %c0_6 = arith.constant 0 : index
    %23 = vector.load %arg4[%c0_5, %c0_6] : memref<1x96xf32, #tpu.memory_space<vmem>>, vector<1x96xf32>
    %24 = vector.broadcast %23 : vector<1x96xf32> to vector<256x96xf32>
    %25 = arith.addf %22, %24 : vector<256x96xf32>
    %cst_7 = arith.constant 0.000000e+00 : f32
    %26 = vector.broadcast %cst_7 : f32 to vector<256x96xf32>
    %27 = arith.cmpf oge, %25, %26 : vector<256x96xf32>
    %cst_8 = arith.constant 1.000000e-01 : f32
    %28 = vector.broadcast %cst_8 : f32 to vector<256x96xf32>
    %29 = arith.mulf %28, %25 : vector<256x96xf32>
    %30 = arith.select %27, %25, %29 : vector<256x96xi1>, vector<256x96xf32>
    %c0_9 = arith.constant 0 : index
    %c0_10 = arith.constant 0 : index
    %31 = vector.load %arg5[%c0_9, %c0_10] : memref<96x96xf32, #tpu.memory_space<vmem>>, vector<96x96xf32>
    %cst_11 = arith.constant dense<0.000000e+00> : vector<256x96xf32>
    %32 = tpu.matmul %30, %31, %cst_11 {dimension_numbers = #tpu.dot_dimension_numbers<[1], [0], [0], [1], [0, 0, 1, 1], [], []>} : vector<256x96xf32>, vector<96x96xf32>, vector<256x96xf32> -> vector<256x96xf32>
    %c0_12 = arith.constant 0 : index
    %c0_13 = arith.constant 0 : index
    %33 = vector.load %arg6[%c0_12, %c0_13] : memref<1x96xf32, #tpu.memory_space<vmem>>, vector<1x96xf32>
    %34 = vector.broadcast %33 : vector<1x96xf32> to vector<256x96xf32>
    %35 = arith.addf %32, %34 : vector<256x96xf32>
    %c0_14 = arith.constant 0 : index
    %c0_15 = arith.constant 0 : index
    %c0_16 = arith.constant 0 : index
    %36 = vector.load %arg7[%c0_14, %c0_15, %c0_16] : memref<1x256x96xf32, #tpu.memory_space<vmem>>, vector<1x256x96xf32>
    %37 = vector.shape_cast %36 : vector<1x256x96xf32> to vector<256x96xf32>
    %38 = vector.shape_cast %35 : vector<256x96xf32> to vector<1x256x96xf32>
    tpu.vector_store %arg7[%c0_14, %c0_15, %c0_16], %38 {strides = array<i32>} : memref<1x256x96xf32, #tpu.memory_space<vmem>>, vector<1x256x96xf32>,
    return
  }
  func.func @transform_0(%arg0: i32, %arg1: i32) -> (i32, i32, i32, i32) {
    %c0_i32 = arith.constant 0 : i32
    %c0_i32_0 = arith.constant 0 : i32
    %c0_i32_1 = arith.constant 0 : i32
    %c0_i32_2 = arith.constant 0 : i32
    return %arg0, %c0_i32, %c0_i32_0, %c0_i32_1 : i32, i32, i32, i32
  }
  func.func @transform_1(%arg0: i32, %arg1: i32) -> (i32, i32) {
    %c0_i32 = arith.constant 0 : i32
    %c0_i32_0 = arith.constant 0 : i32
    %c0_i32_1 = arith.constant 0 : i32
    return %c0_i32, %c0_i32_0 : i32, i32
  }
  func.func @transform_2(%arg0: i32, %arg1: i32) -> (i32, i32) {
    %c0_i32 = arith.constant 0 : i32
    %c0_i32_0 = arith.constant 0 : i32
    %c0_i32_1 = arith.constant 0 : i32
    return %c0_i32, %c0_i32_0 : i32, i32
  }
  func.func @transform_3(%arg0: i32, %arg1: i32) -> (i32, i32) {
    %c0_i32 = arith.constant 0 : i32
    %c0_i32_0 = arith.constant 0 : i32
    %c0_i32_1 = arith.constant 0 : i32
    return %c0_i32, %c0_i32_0 : i32, i32
  }
  func.func @transform_4(%arg0: i32, %arg1: i32) -> (i32, i32) {
    %c0_i32 = arith.constant 0 : i32
    %c0_i32_0 = arith.constant 0 : i32
    %c0_i32_1 = arith.constant 0 : i32
    return %c0_i32, %c0_i32_0 : i32, i32
  }
  func.func @transform_5(%arg0: i32, %arg1: i32) -> (i32, i32, i32) {
    %c0_i32 = arith.constant 0 : i32
    %c0_i32_0 = arith.constant 0 : i32
    return %arg0, %arg1, %c0_i32 : i32, i32, i32
  }
}

module attributes {stable_mosaic.version = 11 : i64} {
  func.func @kernel(%arg0: i32, %arg1: i32, %arg2: memref<1x256x48xf32, #tpu.memory_space<vmem>>, %arg3: memref<1x256x384xf32, #tpu.memory_space<vmem>>, %arg4: memref<48x48xf32, #tpu.memory_space<vmem>>, %arg5: memref<48x384xf32, #tpu.memory_space<vmem>>, %arg6: memref<384x32xf32, #tpu.memory_space<vmem>>, %arg7: memref<1x32xf32, #tpu.memory_space<vmem>>, %arg8: memref<1x256x32xf32, #tpu.memory_space<vmem>>) attributes {dimension_semantics = [#tpu.dimension_semantics<parallel>, #tpu.dimension_semantics<parallel>], iteration_bounds = array<i64: 2, 1>, scalar_prefetch = 0 : i64, scratch_operands = 0 : i64, tpu.core_type = #tpu.core_type<tc>, window_params = [{transform_indices = @transform_0, window_bounds = array<i64: 1, 256, 48>}, {transform_indices = @transform_1, window_bounds = array<i64: 1, 256, 384>}, {pipeline_mode = #tpu.pipeline_mode<synchronous>, transform_indices = @transform_2, window_bounds = array<i64: 48, 48>}, {pipeline_mode = #tpu.pipeline_mode<synchronous>, transform_indices = @transform_3, window_bounds = array<i64: 48, 384>}, {pipeline_mode = #tpu.pipeline_mode<synchronous>, transform_indices = @transform_4, window_bounds = array<i64: 384, 32>}, {pipeline_mode = #tpu.pipeline_mode<synchronous>, transform_indices = @transform_5, window_bounds = array<i64: 1, 32>}, {transform_indices = @transform_6, window_bounds = array<i64: 1, 256, 32>}]} {
    %c0 = arith.constant 0 : index
    %c0_0 = arith.constant 0 : index
    %c0_1 = arith.constant 0 : index
    %0 = vector.load %arg2[%c0, %c0_0, %c0_1] : memref<1x256x48xf32, #tpu.memory_space<vmem>>, vector<1x256x48xf32>
    %1 = vector.shape_cast %0 : vector<1x256x48xf32> to vector<256x48xf32>
    %cst = arith.constant dense<0xFF800000> : vector<256xf32>
    %2 = vector.multi_reduction <maximumf>, %1, %cst [1] : vector<256x48xf32> to vector<256xf32>
    %3 = vector.shape_cast %2 : vector<256xf32> to vector<256x1xf32>
    %4 = vector.broadcast %3 : vector<256x1xf32> to vector<256x48xf32>
    %5 = arith.subf %1, %4 : vector<256x48xf32>
    %6 = math.exp %5 : vector<256x48xf32>
    %c0_2 = arith.constant 0 : index
    %c0_3 = arith.constant 0 : index
    %7 = vector.load %arg4[%c0_2, %c0_3] : memref<48x48xf32, #tpu.memory_space<vmem>>, vector<48x48xf32>
    %cst_4 = arith.constant dense<0.000000e+00> : vector<256x48xf32>
    %8 = tpu.matmul %6, %7, %cst_4 {dimension_numbers = #tpu.dot_dimension_numbers<[1], [0], [0], [1], [0, 0, 1, 1], [], []>} : vector<256x48xf32>, vector<48x48xf32>, vector<256x48xf32> -> vector<256x48xf32>
    %cst_5 = arith.constant 9.99999968E-21 : f32
    %9 = vector.broadcast %cst_5 : f32 to vector<256x48xf32>
    %10 = arith.maximumf %8, %9 : vector<256x48xf32>
    %11 = arith.divf %6, %10 : vector<256x48xf32>
    %c0_6 = arith.constant 0 : index
    %c0_7 = arith.constant 0 : index
    %12 = vector.load %arg5[%c0_6, %c0_7] : memref<48x384xf32, #tpu.memory_space<vmem>>, vector<48x384xf32>
    %cst_8 = arith.constant dense<0.000000e+00> : vector<256x384xf32>
    %13 = tpu.matmul %11, %12, %cst_8 {dimension_numbers = #tpu.dot_dimension_numbers<[1], [0], [0], [1], [0, 0, 1, 1], [], []>} : vector<256x48xf32>, vector<48x384xf32>, vector<256x384xf32> -> vector<256x384xf32>
    %c0_9 = arith.constant 0 : index
    %c0_10 = arith.constant 0 : index
    %c0_11 = arith.constant 0 : index
    %14 = vector.load %arg3[%c0_9, %c0_10, %c0_11] : memref<1x256x384xf32, #tpu.memory_space<vmem>>, vector<1x256x384xf32>
    %15 = vector.shape_cast %14 : vector<1x256x384xf32> to vector<256x384xf32>
    %16 = arith.mulf %13, %15 : vector<256x384xf32>
    %c0_12 = arith.constant 0 : index
    %c0_13 = arith.constant 0 : index
    %17 = vector.load %arg6[%c0_12, %c0_13] : memref<384x32xf32, #tpu.memory_space<vmem>>, vector<384x32xf32>
    %cst_14 = arith.constant dense<0.000000e+00> : vector<256x32xf32>
    %18 = tpu.matmul %16, %17, %cst_14 {dimension_numbers = #tpu.dot_dimension_numbers<[1], [0], [0], [1], [0, 0, 1, 1], [], []>} : vector<256x384xf32>, vector<384x32xf32>, vector<256x32xf32> -> vector<256x32xf32>
    %c0_15 = arith.constant 0 : index
    %c0_16 = arith.constant 0 : index
    %19 = vector.load %arg7[%c0_15, %c0_16] : memref<1x32xf32, #tpu.memory_space<vmem>>, vector<1x32xf32>
    %20 = vector.broadcast %19 : vector<1x32xf32> to vector<256x32xf32>
    %21 = arith.addf %18, %20 : vector<256x32xf32>
    %c0_17 = arith.constant 0 : index
    %c0_18 = arith.constant 0 : index
    %c0_19 = arith.constant 0 : index
    %22 = vector.load %arg8[%c0_17, %c0_18, %c0_19] : memref<1x256x32xf32, #tpu.memory_space<vmem>>, vector<1x256x32xf32>
    %23 = vector.shape_cast %22 : vector<1x256x32xf32> to vector<256x32xf32>
    %24 = vector.shape_cast %21 : vector<256x32xf32> to vector<1x256x32xf32>
    tpu.vector_store %arg8[%c0_17, %c0_18, %c0_19], %24 {strides = array<i32>} : memref<1x256x32xf32, #tpu.memory_space<vmem>>, vector<1x256x32xf32>,
    return
  }
  func.func @transform_0(%arg0: i32, %arg1: i32) -> (i32, i32, i32) {
    %c0_i32 = arith.constant 0 : i32
    %c0_i32_0 = arith.constant 0 : i32
    return %arg0, %arg1, %c0_i32 : i32, i32, i32
  }
  func.func @transform_1(%arg0: i32, %arg1: i32) -> (i32, i32, i32) {
    %c0_i32 = arith.constant 0 : i32
    %c0_i32_0 = arith.constant 0 : i32
    return %arg0, %arg1, %c0_i32 : i32, i32, i32
  }
  func.func @transform_2(%arg0: i32, %arg1: i32) -> (i32, i32) {
    %c0_i32 = arith.constant 0 : i32
    %c0_i32_0 = arith.constant 0 : i32
    %c0_i32_1 = arith.constant 0 : i32
    return %c0_i32, %c0_i32_0 : i32, i32
  }
  func.func @transform_3(%arg0: i32, %arg1: i32) -> (i32, i32) {
    %c0_i32 = arith.constant 0 : i32
    %c0_i32_0 = arith.constant 0 : i32
    %c0_i32_1 = arith.constant 0 : i32
    return %c0_i32, %c0_i32_0 : i32, i32
  }
  func.func @transform_4(%arg0: i32, %arg1: i32) -> (i32, i32) {
    %c0_i32 = arith.constant 0 : i32
    %c0_i32_0 = arith.constant 0 : i32
    %c0_i32_1 = arith.constant 0 : i32
    return %c0_i32, %c0_i32_0 : i32, i32
  }
  func.func @transform_5(%arg0: i32, %arg1: i32) -> (i32, i32) {
    %c0_i32 = arith.constant 0 : i32
    %c0_i32_0 = arith.constant 0 : i32
    %c0_i32_1 = arith.constant 0 : i32
    return %c0_i32, %c0_i32_0 : i32, i32
  }
  func.func @transform_6(%arg0: i32, %arg1: i32) -> (i32, i32, i32) {
    %c0_i32 = arith.constant 0 : i32
    %c0_i32_0 = arith.constant 0 : i32
    return %arg0, %arg1, %c0_i32 : i32, i32, i32
  }
}

module attributes {stable_mosaic.version = 11 : i64} {
  func.func @kernel(%arg0: i32, %arg1: i32, %arg2: memref<1x18x18x32xf32, #tpu.memory_space<vmem>>, %arg3: memref<288x32xf32, #tpu.memory_space<vmem>>, %arg4: memref<1x32xf32, #tpu.memory_space<vmem>>, %arg5: memref<1x256x32xf32, #tpu.memory_space<vmem>>, %arg6: memref<1x256x32xf32, #tpu.memory_space<vmem>>) attributes {dimension_semantics = [#tpu.dimension_semantics<parallel>, #tpu.dimension_semantics<parallel>], iteration_bounds = array<i64: 2, 1>, scalar_prefetch = 0 : i64, scratch_operands = 0 : i64, tpu.core_type = #tpu.core_type<tc>, window_params = [{transform_indices = @transform_0, window_bounds = array<i64: 1, 18, 18, 32>}, {pipeline_mode = #tpu.pipeline_mode<synchronous>, transform_indices = @transform_1, window_bounds = array<i64: 288, 32>}, {pipeline_mode = #tpu.pipeline_mode<synchronous>, transform_indices = @transform_2, window_bounds = array<i64: 1, 32>}, {transform_indices = @transform_3, window_bounds = array<i64: 1, 256, 32>}, {transform_indices = @transform_4, window_bounds = array<i64: 1, 256, 32>}]} {
    %c0 = arith.constant 0 : index
    %c0_0 = arith.constant 0 : index
    %c0_1 = arith.constant 0 : index
    %c0_2 = arith.constant 0 : index
    %0 = vector.load %arg2[%c0, %c0_0, %c0_1, %c0_2] : memref<1x18x18x32xf32, #tpu.memory_space<vmem>>, vector<1x18x18x32xf32>
    %1 = vector.shape_cast %0 : vector<1x18x18x32xf32> to vector<18x18x32xf32>
    %2 = vector.extract_strided_slice %1 {offsets = [0, 0, 0], sizes = [16, 16, 32], strides = [1, 1, 1]} : vector<18x18x32xf32> to vector<16x16x32xf32>
    %3 = vector.shape_cast %2 : vector<16x16x32xf32> to vector<256x32xf32>
    %4 = vector.extract_strided_slice %1 {offsets = [0, 1, 0], sizes = [16, 16, 32], strides = [1, 1, 1]} : vector<18x18x32xf32> to vector<16x16x32xf32>
    %5 = vector.shape_cast %4 : vector<16x16x32xf32> to vector<256x32xf32>
    %6 = vector.extract_strided_slice %1 {offsets = [0, 2, 0], sizes = [16, 16, 32], strides = [1, 1, 1]} : vector<18x18x32xf32> to vector<16x16x32xf32>
    %7 = vector.shape_cast %6 : vector<16x16x32xf32> to vector<256x32xf32>
    %8 = vector.extract_strided_slice %1 {offsets = [1, 0, 0], sizes = [16, 16, 32], strides = [1, 1, 1]} : vector<18x18x32xf32> to vector<16x16x32xf32>
    %9 = vector.shape_cast %8 : vector<16x16x32xf32> to vector<256x32xf32>
    %10 = vector.extract_strided_slice %1 {offsets = [1, 1, 0], sizes = [16, 16, 32], strides = [1, 1, 1]} : vector<18x18x32xf32> to vector<16x16x32xf32>
    %11 = vector.shape_cast %10 : vector<16x16x32xf32> to vector<256x32xf32>
    %12 = vector.extract_strided_slice %1 {offsets = [1, 2, 0], sizes = [16, 16, 32], strides = [1, 1, 1]} : vector<18x18x32xf32> to vector<16x16x32xf32>
    %13 = vector.shape_cast %12 : vector<16x16x32xf32> to vector<256x32xf32>
    %14 = vector.extract_strided_slice %1 {offsets = [2, 0, 0], sizes = [16, 16, 32], strides = [1, 1, 1]} : vector<18x18x32xf32> to vector<16x16x32xf32>
    %15 = vector.shape_cast %14 : vector<16x16x32xf32> to vector<256x32xf32>
    %16 = vector.extract_strided_slice %1 {offsets = [2, 1, 0], sizes = [16, 16, 32], strides = [1, 1, 1]} : vector<18x18x32xf32> to vector<16x16x32xf32>
    %17 = vector.shape_cast %16 : vector<16x16x32xf32> to vector<256x32xf32>
    %18 = vector.extract_strided_slice %1 {offsets = [2, 2, 0], sizes = [16, 16, 32], strides = [1, 1, 1]} : vector<18x18x32xf32> to vector<16x16x32xf32>
    %19 = vector.shape_cast %18 : vector<16x16x32xf32> to vector<256x32xf32>
    %20 = tpu.concatenate %3, %5, %7, %9, %11, %13, %15, %17, %19 in 1 : vector<256x32xf32>, vector<256x32xf32>, vector<256x32xf32>, vector<256x32xf32>, vector<256x32xf32>, vector<256x32xf32>, vector<256x32xf32>, vector<256x32xf32>, vector<256x32xf32> -> vector<256x288xf32>
    %c0_3 = arith.constant 0 : index
    %c0_4 = arith.constant 0 : index
    %21 = vector.load %arg3[%c0_3, %c0_4] : memref<288x32xf32, #tpu.memory_space<vmem>>, vector<288x32xf32>
    %cst = arith.constant dense<0.000000e+00> : vector<256x32xf32>
    %22 = tpu.matmul %20, %21, %cst {dimension_numbers = #tpu.dot_dimension_numbers<[1], [0], [0], [1], [0, 0, 1, 1], [], []>} : vector<256x288xf32>, vector<288x32xf32>, vector<256x32xf32> -> vector<256x32xf32>
    %c0_5 = arith.constant 0 : index
    %c0_6 = arith.constant 0 : index
    %23 = vector.load %arg4[%c0_5, %c0_6] : memref<1x32xf32, #tpu.memory_space<vmem>>, vector<1x32xf32>
    %24 = vector.broadcast %23 : vector<1x32xf32> to vector<256x32xf32>
    %25 = arith.addf %22, %24 : vector<256x32xf32>
    %c0_7 = arith.constant 0 : index
    %c0_8 = arith.constant 0 : index
    %c0_9 = arith.constant 0 : index
    %26 = vector.load %arg5[%c0_7, %c0_8, %c0_9] : memref<1x256x32xf32, #tpu.memory_space<vmem>>, vector<1x256x32xf32>
    %27 = vector.shape_cast %26 : vector<1x256x32xf32> to vector<256x32xf32>
    %28 = arith.addf %25, %27 : vector<256x32xf32>
    %c0_10 = arith.constant 0 : index
    %c0_11 = arith.constant 0 : index
    %c0_12 = arith.constant 0 : index
    %29 = vector.load %arg6[%c0_10, %c0_11, %c0_12] : memref<1x256x32xf32, #tpu.memory_space<vmem>>, vector<1x256x32xf32>
    %30 = vector.shape_cast %29 : vector<1x256x32xf32> to vector<256x32xf32>
    %31 = vector.shape_cast %28 : vector<256x32xf32> to vector<1x256x32xf32>
    tpu.vector_store %arg6[%c0_10, %c0_11, %c0_12], %31 {strides = array<i32>} : memref<1x256x32xf32, #tpu.memory_space<vmem>>, vector<1x256x32xf32>,
    return
  }
  func.func @transform_0(%arg0: i32, %arg1: i32) -> (i32, i32, i32, i32) {
    %c0_i32 = arith.constant 0 : i32
    %c0_i32_0 = arith.constant 0 : i32
    %c0_i32_1 = arith.constant 0 : i32
    %c0_i32_2 = arith.constant 0 : i32
    return %arg0, %c0_i32, %c0_i32_0, %c0_i32_1 : i32, i32, i32, i32
  }
  func.func @transform_1(%arg0: i32, %arg1: i32) -> (i32, i32) {
    %c0_i32 = arith.constant 0 : i32
    %c0_i32_0 = arith.constant 0 : i32
    %c0_i32_1 = arith.constant 0 : i32
    return %c0_i32, %c0_i32_0 : i32, i32
  }
  func.func @transform_2(%arg0: i32, %arg1: i32) -> (i32, i32) {
    %c0_i32 = arith.constant 0 : i32
    %c0_i32_0 = arith.constant 0 : i32
    %c0_i32_1 = arith.constant 0 : i32
    return %c0_i32, %c0_i32_0 : i32, i32
  }
  func.func @transform_3(%arg0: i32, %arg1: i32) -> (i32, i32, i32) {
    %c0_i32 = arith.constant 0 : i32
    %c0_i32_0 = arith.constant 0 : i32
    return %arg0, %arg1, %c0_i32 : i32, i32, i32
  }
  func.func @transform_4(%arg0: i32, %arg1: i32) -> (i32, i32, i32) {
    %c0_i32 = arith.constant 0 : i32
    %c0_i32_0 = arith.constant 0 : i32
    return %arg0, %arg1, %c0_i32 : i32, i32, i32
  }
}

module attributes {stable_mosaic.version = 11 : i64} {
  func.func @kernel(%arg0: i32, %arg1: i32, %arg2: memref<1x20x20x64xf32, #tpu.memory_space<vmem>>, %arg3: memref<576x32xf32, #tpu.memory_space<vmem>>, %arg4: memref<1x32xf32, #tpu.memory_space<vmem>>, %arg5: memref<1x256x32xf32, #tpu.memory_space<vmem>>) attributes {dimension_semantics = [#tpu.dimension_semantics<parallel>, #tpu.dimension_semantics<parallel>], iteration_bounds = array<i64: 2, 1>, scalar_prefetch = 0 : i64, scratch_operands = 0 : i64, tpu.core_type = #tpu.core_type<tc>, window_params = [{transform_indices = @transform_0, window_bounds = array<i64: 1, 20, 20, 64>}, {pipeline_mode = #tpu.pipeline_mode<synchronous>, transform_indices = @transform_1, window_bounds = array<i64: 576, 32>}, {pipeline_mode = #tpu.pipeline_mode<synchronous>, transform_indices = @transform_2, window_bounds = array<i64: 1, 32>}, {transform_indices = @transform_3, window_bounds = array<i64: 1, 256, 32>}]} {
    %c0 = arith.constant 0 : index
    %c0_0 = arith.constant 0 : index
    %c0_1 = arith.constant 0 : index
    %c0_2 = arith.constant 0 : index
    %0 = vector.load %arg2[%c0, %c0_0, %c0_1, %c0_2] : memref<1x20x20x64xf32, #tpu.memory_space<vmem>>, vector<1x20x20x64xf32>
    %1 = vector.shape_cast %0 : vector<1x20x20x64xf32> to vector<20x20x64xf32>
    %2 = vector.extract_strided_slice %1 {offsets = [0, 0, 0], sizes = [16, 16, 64], strides = [1, 1, 1]} : vector<20x20x64xf32> to vector<16x16x64xf32>
    %3 = vector.shape_cast %2 : vector<16x16x64xf32> to vector<256x64xf32>
    %4 = vector.extract_strided_slice %1 {offsets = [0, 2, 0], sizes = [16, 16, 64], strides = [1, 1, 1]} : vector<20x20x64xf32> to vector<16x16x64xf32>
    %5 = vector.shape_cast %4 : vector<16x16x64xf32> to vector<256x64xf32>
    %6 = vector.extract_strided_slice %1 {offsets = [0, 4, 0], sizes = [16, 16, 64], strides = [1, 1, 1]} : vector<20x20x64xf32> to vector<16x16x64xf32>
    %7 = vector.shape_cast %6 : vector<16x16x64xf32> to vector<256x64xf32>
    %8 = vector.extract_strided_slice %1 {offsets = [2, 0, 0], sizes = [16, 16, 64], strides = [1, 1, 1]} : vector<20x20x64xf32> to vector<16x16x64xf32>
    %9 = vector.shape_cast %8 : vector<16x16x64xf32> to vector<256x64xf32>
    %10 = vector.extract_strided_slice %1 {offsets = [2, 2, 0], sizes = [16, 16, 64], strides = [1, 1, 1]} : vector<20x20x64xf32> to vector<16x16x64xf32>
    %11 = vector.shape_cast %10 : vector<16x16x64xf32> to vector<256x64xf32>
    %12 = vector.extract_strided_slice %1 {offsets = [2, 4, 0], sizes = [16, 16, 64], strides = [1, 1, 1]} : vector<20x20x64xf32> to vector<16x16x64xf32>
    %13 = vector.shape_cast %12 : vector<16x16x64xf32> to vector<256x64xf32>
    %14 = vector.extract_strided_slice %1 {offsets = [4, 0, 0], sizes = [16, 16, 64], strides = [1, 1, 1]} : vector<20x20x64xf32> to vector<16x16x64xf32>
    %15 = vector.shape_cast %14 : vector<16x16x64xf32> to vector<256x64xf32>
    %16 = vector.extract_strided_slice %1 {offsets = [4, 2, 0], sizes = [16, 16, 64], strides = [1, 1, 1]} : vector<20x20x64xf32> to vector<16x16x64xf32>
    %17 = vector.shape_cast %16 : vector<16x16x64xf32> to vector<256x64xf32>
    %18 = vector.extract_strided_slice %1 {offsets = [4, 4, 0], sizes = [16, 16, 64], strides = [1, 1, 1]} : vector<20x20x64xf32> to vector<16x16x64xf32>
    %19 = vector.shape_cast %18 : vector<16x16x64xf32> to vector<256x64xf32>
    %20 = tpu.concatenate %3, %5, %7, %9, %11, %13, %15, %17, %19 in 1 : vector<256x64xf32>, vector<256x64xf32>, vector<256x64xf32>, vector<256x64xf32>, vector<256x64xf32>, vector<256x64xf32>, vector<256x64xf32>, vector<256x64xf32>, vector<256x64xf32> -> vector<256x576xf32>
    %c0_3 = arith.constant 0 : index
    %c0_4 = arith.constant 0 : index
    %21 = vector.load %arg3[%c0_3, %c0_4] : memref<576x32xf32, #tpu.memory_space<vmem>>, vector<576x32xf32>
    %cst = arith.constant dense<0.000000e+00> : vector<256x32xf32>
    %22 = tpu.matmul %20, %21, %cst {dimension_numbers = #tpu.dot_dimension_numbers<[1], [0], [0], [1], [0, 0, 1, 1], [], []>} : vector<256x576xf32>, vector<576x32xf32>, vector<256x32xf32> -> vector<256x32xf32>
    %c0_5 = arith.constant 0 : index
    %c0_6 = arith.constant 0 : index
    %23 = vector.load %arg4[%c0_5, %c0_6] : memref<1x32xf32, #tpu.memory_space<vmem>>, vector<1x32xf32>
    %24 = vector.broadcast %23 : vector<1x32xf32> to vector<256x32xf32>
    %25 = arith.addf %22, %24 : vector<256x32xf32>
    %cst_7 = arith.constant 0.000000e+00 : f32
    %26 = vector.broadcast %cst_7 : f32 to vector<256x32xf32>
    %27 = arith.cmpf oge, %25, %26 : vector<256x32xf32>
    %cst_8 = arith.constant 1.000000e-01 : f32
    %28 = vector.broadcast %cst_8 : f32 to vector<256x32xf32>
    %29 = arith.mulf %28, %25 : vector<256x32xf32>
    %30 = arith.select %27, %25, %29 : vector<256x32xi1>, vector<256x32xf32>
    %c0_9 = arith.constant 0 : index
    %c0_10 = arith.constant 0 : index
    %c0_11 = arith.constant 0 : index
    %31 = vector.load %arg5[%c0_9, %c0_10, %c0_11] : memref<1x256x32xf32, #tpu.memory_space<vmem>>, vector<1x256x32xf32>
    %32 = vector.shape_cast %31 : vector<1x256x32xf32> to vector<256x32xf32>
    %33 = vector.shape_cast %30 : vector<256x32xf32> to vector<1x256x32xf32>
    tpu.vector_store %arg5[%c0_9, %c0_10, %c0_11], %33 {strides = array<i32>} : memref<1x256x32xf32, #tpu.memory_space<vmem>>, vector<1x256x32xf32>,
    return
  }
  func.func @transform_0(%arg0: i32, %arg1: i32) -> (i32, i32, i32, i32) {
    %c0_i32 = arith.constant 0 : i32
    %c0_i32_0 = arith.constant 0 : i32
    %c0_i32_1 = arith.constant 0 : i32
    %c0_i32_2 = arith.constant 0 : i32
    return %arg0, %c0_i32, %c0_i32_0, %c0_i32_1 : i32, i32, i32, i32
  }
  func.func @transform_1(%arg0: i32, %arg1: i32) -> (i32, i32) {
    %c0_i32 = arith.constant 0 : i32
    %c0_i32_0 = arith.constant 0 : i32
    %c0_i32_1 = arith.constant 0 : i32
    return %c0_i32, %c0_i32_0 : i32, i32
  }
  func.func @transform_2(%arg0: i32, %arg1: i32) -> (i32, i32) {
    %c0_i32 = arith.constant 0 : i32
    %c0_i32_0 = arith.constant 0 : i32
    %c0_i32_1 = arith.constant 0 : i32
    return %c0_i32, %c0_i32_0 : i32, i32
  }
  func.func @transform_3(%arg0: i32, %arg1: i32) -> (i32, i32, i32) {
    %c0_i32 = arith.constant 0 : i32
    %c0_i32_0 = arith.constant 0 : i32
    return %arg0, %arg1, %c0_i32 : i32, i32, i32
  }
}

module attributes {stable_mosaic.version = 11 : i64} {
  func.func @kernel(%arg0: i32, %arg1: i32, %arg2: memref<1x18x18x32xf32, #tpu.memory_space<vmem>>, %arg3: memref<288x32xf32, #tpu.memory_space<vmem>>, %arg4: memref<1x32xf32, #tpu.memory_space<vmem>>, %arg5: memref<1x256x32xf32, #tpu.memory_space<vmem>>, %arg6: memref<32x32xf32, #tpu.memory_space<vmem>>, %arg7: memref<1x32xf32, #tpu.memory_space<vmem>>, %arg8: memref<1x256x32xf32, #tpu.memory_space<vmem>>) attributes {dimension_semantics = [#tpu.dimension_semantics<parallel>, #tpu.dimension_semantics<parallel>], iteration_bounds = array<i64: 2, 1>, scalar_prefetch = 0 : i64, scratch_operands = 0 : i64, tpu.core_type = #tpu.core_type<tc>, window_params = [{transform_indices = @transform_0, window_bounds = array<i64: 1, 18, 18, 32>}, {pipeline_mode = #tpu.pipeline_mode<synchronous>, transform_indices = @transform_1, window_bounds = array<i64: 288, 32>}, {pipeline_mode = #tpu.pipeline_mode<synchronous>, transform_indices = @transform_2, window_bounds = array<i64: 1, 32>}, {transform_indices = @transform_3, window_bounds = array<i64: 1, 256, 32>}, {pipeline_mode = #tpu.pipeline_mode<synchronous>, transform_indices = @transform_4, window_bounds = array<i64: 32, 32>}, {pipeline_mode = #tpu.pipeline_mode<synchronous>, transform_indices = @transform_5, window_bounds = array<i64: 1, 32>}, {transform_indices = @transform_6, window_bounds = array<i64: 1, 256, 32>}]} {
    %c0 = arith.constant 0 : index
    %c0_0 = arith.constant 0 : index
    %c0_1 = arith.constant 0 : index
    %c0_2 = arith.constant 0 : index
    %0 = vector.load %arg2[%c0, %c0_0, %c0_1, %c0_2] : memref<1x18x18x32xf32, #tpu.memory_space<vmem>>, vector<1x18x18x32xf32>
    %1 = vector.shape_cast %0 : vector<1x18x18x32xf32> to vector<18x18x32xf32>
    %2 = vector.extract_strided_slice %1 {offsets = [0, 0, 0], sizes = [16, 16, 32], strides = [1, 1, 1]} : vector<18x18x32xf32> to vector<16x16x32xf32>
    %3 = vector.shape_cast %2 : vector<16x16x32xf32> to vector<256x32xf32>
    %4 = vector.extract_strided_slice %1 {offsets = [0, 1, 0], sizes = [16, 16, 32], strides = [1, 1, 1]} : vector<18x18x32xf32> to vector<16x16x32xf32>
    %5 = vector.shape_cast %4 : vector<16x16x32xf32> to vector<256x32xf32>
    %6 = vector.extract_strided_slice %1 {offsets = [0, 2, 0], sizes = [16, 16, 32], strides = [1, 1, 1]} : vector<18x18x32xf32> to vector<16x16x32xf32>
    %7 = vector.shape_cast %6 : vector<16x16x32xf32> to vector<256x32xf32>
    %8 = vector.extract_strided_slice %1 {offsets = [1, 0, 0], sizes = [16, 16, 32], strides = [1, 1, 1]} : vector<18x18x32xf32> to vector<16x16x32xf32>
    %9 = vector.shape_cast %8 : vector<16x16x32xf32> to vector<256x32xf32>
    %10 = vector.extract_strided_slice %1 {offsets = [1, 1, 0], sizes = [16, 16, 32], strides = [1, 1, 1]} : vector<18x18x32xf32> to vector<16x16x32xf32>
    %11 = vector.shape_cast %10 : vector<16x16x32xf32> to vector<256x32xf32>
    %12 = vector.extract_strided_slice %1 {offsets = [1, 2, 0], sizes = [16, 16, 32], strides = [1, 1, 1]} : vector<18x18x32xf32> to vector<16x16x32xf32>
    %13 = vector.shape_cast %12 : vector<16x16x32xf32> to vector<256x32xf32>
    %14 = vector.extract_strided_slice %1 {offsets = [2, 0, 0], sizes = [16, 16, 32], strides = [1, 1, 1]} : vector<18x18x32xf32> to vector<16x16x32xf32>
    %15 = vector.shape_cast %14 : vector<16x16x32xf32> to vector<256x32xf32>
    %16 = vector.extract_strided_slice %1 {offsets = [2, 1, 0], sizes = [16, 16, 32], strides = [1, 1, 1]} : vector<18x18x32xf32> to vector<16x16x32xf32>
    %17 = vector.shape_cast %16 : vector<16x16x32xf32> to vector<256x32xf32>
    %18 = vector.extract_strided_slice %1 {offsets = [2, 2, 0], sizes = [16, 16, 32], strides = [1, 1, 1]} : vector<18x18x32xf32> to vector<16x16x32xf32>
    %19 = vector.shape_cast %18 : vector<16x16x32xf32> to vector<256x32xf32>
    %20 = tpu.concatenate %3, %5, %7, %9, %11, %13, %15, %17, %19 in 1 : vector<256x32xf32>, vector<256x32xf32>, vector<256x32xf32>, vector<256x32xf32>, vector<256x32xf32>, vector<256x32xf32>, vector<256x32xf32>, vector<256x32xf32>, vector<256x32xf32> -> vector<256x288xf32>
    %c0_3 = arith.constant 0 : index
    %c0_4 = arith.constant 0 : index
    %21 = vector.load %arg3[%c0_3, %c0_4] : memref<288x32xf32, #tpu.memory_space<vmem>>, vector<288x32xf32>
    %cst = arith.constant dense<0.000000e+00> : vector<256x32xf32>
    %22 = tpu.matmul %20, %21, %cst {dimension_numbers = #tpu.dot_dimension_numbers<[1], [0], [0], [1], [0, 0, 1, 1], [], []>} : vector<256x288xf32>, vector<288x32xf32>, vector<256x32xf32> -> vector<256x32xf32>
    %c0_5 = arith.constant 0 : index
    %c0_6 = arith.constant 0 : index
    %23 = vector.load %arg4[%c0_5, %c0_6] : memref<1x32xf32, #tpu.memory_space<vmem>>, vector<1x32xf32>
    %24 = vector.broadcast %23 : vector<1x32xf32> to vector<256x32xf32>
    %25 = arith.addf %22, %24 : vector<256x32xf32>
    %c0_7 = arith.constant 0 : index
    %c0_8 = arith.constant 0 : index
    %c0_9 = arith.constant 0 : index
    %26 = vector.load %arg5[%c0_7, %c0_8, %c0_9] : memref<1x256x32xf32, #tpu.memory_space<vmem>>, vector<1x256x32xf32>
    %27 = vector.shape_cast %26 : vector<1x256x32xf32> to vector<256x32xf32>
    %28 = arith.addf %25, %27 : vector<256x32xf32>
    %c0_10 = arith.constant 0 : index
    %c0_11 = arith.constant 0 : index
    %29 = vector.load %arg6[%c0_10, %c0_11] : memref<32x32xf32, #tpu.memory_space<vmem>>, vector<32x32xf32>
    %cst_12 = arith.constant dense<0.000000e+00> : vector<256x32xf32>
    %30 = tpu.matmul %28, %29, %cst_12 {dimension_numbers = #tpu.dot_dimension_numbers<[1], [0], [0], [1], [0, 0, 1, 1], [], []>} : vector<256x32xf32>, vector<32x32xf32>, vector<256x32xf32> -> vector<256x32xf32>
    %c0_13 = arith.constant 0 : index
    %c0_14 = arith.constant 0 : index
    %31 = vector.load %arg7[%c0_13, %c0_14] : memref<1x32xf32, #tpu.memory_space<vmem>>, vector<1x32xf32>
    %32 = vector.broadcast %31 : vector<1x32xf32> to vector<256x32xf32>
    %33 = arith.addf %30, %32 : vector<256x32xf32>
    %cst_15 = arith.constant 0.000000e+00 : f32
    %34 = vector.broadcast %cst_15 : f32 to vector<256x32xf32>
    %35 = arith.cmpf oge, %33, %34 : vector<256x32xf32>
    %cst_16 = arith.constant 1.000000e-01 : f32
    %36 = vector.broadcast %cst_16 : f32 to vector<256x32xf32>
    %37 = arith.mulf %36, %33 : vector<256x32xf32>
    %38 = arith.select %35, %33, %37 : vector<256x32xi1>, vector<256x32xf32>
    %c0_17 = arith.constant 0 : index
    %c0_18 = arith.constant 0 : index
    %c0_19 = arith.constant 0 : index
    %39 = vector.load %arg8[%c0_17, %c0_18, %c0_19] : memref<1x256x32xf32, #tpu.memory_space<vmem>>, vector<1x256x32xf32>
    %40 = vector.shape_cast %39 : vector<1x256x32xf32> to vector<256x32xf32>
    %41 = vector.shape_cast %38 : vector<256x32xf32> to vector<1x256x32xf32>
    tpu.vector_store %arg8[%c0_17, %c0_18, %c0_19], %41 {strides = array<i32>} : memref<1x256x32xf32, #tpu.memory_space<vmem>>, vector<1x256x32xf32>,
    return
  }
  func.func @transform_0(%arg0: i32, %arg1: i32) -> (i32, i32, i32, i32) {
    %c0_i32 = arith.constant 0 : i32
    %c0_i32_0 = arith.constant 0 : i32
    %c0_i32_1 = arith.constant 0 : i32
    %c0_i32_2 = arith.constant 0 : i32
    return %arg0, %c0_i32, %c0_i32_0, %c0_i32_1 : i32, i32, i32, i32
  }
  func.func @transform_1(%arg0: i32, %arg1: i32) -> (i32, i32) {
    %c0_i32 = arith.constant 0 : i32
    %c0_i32_0 = arith.constant 0 : i32
    %c0_i32_1 = arith.constant 0 : i32
    return %c0_i32, %c0_i32_0 : i32, i32
  }
  func.func @transform_2(%arg0: i32, %arg1: i32) -> (i32, i32) {
    %c0_i32 = arith.constant 0 : i32
    %c0_i32_0 = arith.constant 0 : i32
    %c0_i32_1 = arith.constant 0 : i32
    return %c0_i32, %c0_i32_0 : i32, i32
  }
  func.func @transform_3(%arg0: i32, %arg1: i32) -> (i32, i32, i32) {
    %c0_i32 = arith.constant 0 : i32
    %c0_i32_0 = arith.constant 0 : i32
    return %arg0, %arg1, %c0_i32 : i32, i32, i32
  }
  func.func @transform_4(%arg0: i32, %arg1: i32) -> (i32, i32) {
    %c0_i32 = arith.constant 0 : i32
    %c0_i32_0 = arith.constant 0 : i32
    %c0_i32_1 = arith.constant 0 : i32
    return %c0_i32, %c0_i32_0 : i32, i32
  }
  func.func @transform_5(%arg0: i32, %arg1: i32) -> (i32, i32) {
    %c0_i32 = arith.constant 0 : i32
    %c0_i32_0 = arith.constant 0 : i32
    %c0_i32_1 = arith.constant 0 : i32
    return %c0_i32, %c0_i32_0 : i32, i32
  }
  func.func @transform_6(%arg0: i32, %arg1: i32) -> (i32, i32, i32) {
    %c0_i32 = arith.constant 0 : i32
    %c0_i32_0 = arith.constant 0 : i32
    return %arg0, %arg1, %c0_i32 : i32, i32, i32
  }
}

module attributes {stable_mosaic.version = 11 : i64} {
  func.func @kernel(%arg0: i32, %arg1: i32, %arg2: memref<1x18x18x100xf32, #tpu.memory_space<vmem>>, %arg3: memref<9x100x96xf32, #tpu.memory_space<vmem>>, %arg4: memref<1x96xf32, #tpu.memory_space<vmem>>, %arg5: memref<96x144xf32, #tpu.memory_space<vmem>>, %arg6: memref<1x144xf32, #tpu.memory_space<vmem>>, %arg7: memref<1x256x144xf32, #tpu.memory_space<vmem>>) attributes {dimension_semantics = [#tpu.dimension_semantics<parallel>, #tpu.dimension_semantics<parallel>], iteration_bounds = array<i64: 2, 1>, scalar_prefetch = 0 : i64, scratch_operands = 0 : i64, tpu.core_type = #tpu.core_type<tc>, window_params = [{transform_indices = @transform_0, window_bounds = array<i64: 1, 18, 18, 100>}, {pipeline_mode = #tpu.pipeline_mode<synchronous>, transform_indices = @transform_1, window_bounds = array<i64: 9, 100, 96>}, {pipeline_mode = #tpu.pipeline_mode<synchronous>, transform_indices = @transform_2, window_bounds = array<i64: 1, 96>}, {pipeline_mode = #tpu.pipeline_mode<synchronous>, transform_indices = @transform_3, window_bounds = array<i64: 96, 144>}, {pipeline_mode = #tpu.pipeline_mode<synchronous>, transform_indices = @transform_4, window_bounds = array<i64: 1, 144>}, {transform_indices = @transform_5, window_bounds = array<i64: 1, 256, 144>}]} {
    %c0 = arith.constant 0 : index
    %c0_0 = arith.constant 0 : index
    %c0_1 = arith.constant 0 : index
    %c0_2 = arith.constant 0 : index
    %0 = vector.load %arg2[%c0, %c0_0, %c0_1, %c0_2] : memref<1x18x18x100xf32, #tpu.memory_space<vmem>>, vector<1x18x18x100xf32>
    %1 = vector.shape_cast %0 : vector<1x18x18x100xf32> to vector<18x18x100xf32>
    %2 = vector.extract_strided_slice %1 {offsets = [0, 0, 0], sizes = [16, 16, 100], strides = [1, 1, 1]} : vector<18x18x100xf32> to vector<16x16x100xf32>
    %3 = vector.shape_cast %2 : vector<16x16x100xf32> to vector<256x100xf32>
    %4 = vector.extract_strided_slice %1 {offsets = [0, 1, 0], sizes = [16, 16, 100], strides = [1, 1, 1]} : vector<18x18x100xf32> to vector<16x16x100xf32>
    %5 = vector.shape_cast %4 : vector<16x16x100xf32> to vector<256x100xf32>
    %6 = vector.extract_strided_slice %1 {offsets = [0, 2, 0], sizes = [16, 16, 100], strides = [1, 1, 1]} : vector<18x18x100xf32> to vector<16x16x100xf32>
    %7 = vector.shape_cast %6 : vector<16x16x100xf32> to vector<256x100xf32>
    %8 = vector.extract_strided_slice %1 {offsets = [1, 0, 0], sizes = [16, 16, 100], strides = [1, 1, 1]} : vector<18x18x100xf32> to vector<16x16x100xf32>
    %9 = vector.shape_cast %8 : vector<16x16x100xf32> to vector<256x100xf32>
    %10 = vector.extract_strided_slice %1 {offsets = [1, 1, 0], sizes = [16, 16, 100], strides = [1, 1, 1]} : vector<18x18x100xf32> to vector<16x16x100xf32>
    %11 = vector.shape_cast %10 : vector<16x16x100xf32> to vector<256x100xf32>
    %12 = vector.extract_strided_slice %1 {offsets = [1, 2, 0], sizes = [16, 16, 100], strides = [1, 1, 1]} : vector<18x18x100xf32> to vector<16x16x100xf32>
    %13 = vector.shape_cast %12 : vector<16x16x100xf32> to vector<256x100xf32>
    %14 = vector.extract_strided_slice %1 {offsets = [2, 0, 0], sizes = [16, 16, 100], strides = [1, 1, 1]} : vector<18x18x100xf32> to vector<16x16x100xf32>
    %15 = vector.shape_cast %14 : vector<16x16x100xf32> to vector<256x100xf32>
    %16 = vector.extract_strided_slice %1 {offsets = [2, 1, 0], sizes = [16, 16, 100], strides = [1, 1, 1]} : vector<18x18x100xf32> to vector<16x16x100xf32>
    %17 = vector.shape_cast %16 : vector<16x16x100xf32> to vector<256x100xf32>
    %18 = vector.extract_strided_slice %1 {offsets = [2, 2, 0], sizes = [16, 16, 100], strides = [1, 1, 1]} : vector<18x18x100xf32> to vector<16x16x100xf32>
    %19 = vector.shape_cast %18 : vector<16x16x100xf32> to vector<256x100xf32>
    %cst = arith.constant 0.000000e+00 : f32
    %20 = vector.broadcast %cst : f32 to vector<256x96xf32>
    %c0_3 = arith.constant 0 : index
    %c0_4 = arith.constant 0 : index
    %c0_5 = arith.constant 0 : index
    %21 = vector.load %arg3[%c0_3, %c0_4, %c0_5] : memref<9x100x96xf32, #tpu.memory_space<vmem>>, vector<1x100x96xf32>
    %22 = vector.shape_cast %21 : vector<1x100x96xf32> to vector<100x96xf32>
    %cst_6 = arith.constant dense<0.000000e+00> : vector<256x96xf32>
    %23 = tpu.matmul %3, %22, %cst_6 {dimension_numbers = #tpu.dot_dimension_numbers<[1], [0], [0], [1], [0, 0, 1, 1], [], []>} : vector<256x100xf32>, vector<100x96xf32>, vector<256x96xf32> -> vector<256x96xf32>
    %24 = arith.addf %20, %23 : vector<256x96xf32>
    %c1 = arith.constant 1 : index
    %c0_7 = arith.constant 0 : index
    %c0_8 = arith.constant 0 : index
    %25 = vector.load %arg3[%c1, %c0_7, %c0_8] : memref<9x100x96xf32, #tpu.memory_space<vmem>>, vector<1x100x96xf32>
    %26 = vector.shape_cast %25 : vector<1x100x96xf32> to vector<100x96xf32>
    %cst_9 = arith.constant dense<0.000000e+00> : vector<256x96xf32>
    %27 = tpu.matmul %5, %26, %cst_9 {dimension_numbers = #tpu.dot_dimension_numbers<[1], [0], [0], [1], [0, 0, 1, 1], [], []>} : vector<256x100xf32>, vector<100x96xf32>, vector<256x96xf32> -> vector<256x96xf32>
    %28 = arith.addf %24, %27 : vector<256x96xf32>
    %c2 = arith.constant 2 : index
    %c0_10 = arith.constant 0 : index
    %c0_11 = arith.constant 0 : index
    %29 = vector.load %arg3[%c2, %c0_10, %c0_11] : memref<9x100x96xf32, #tpu.memory_space<vmem>>, vector<1x100x96xf32>
    %30 = vector.shape_cast %29 : vector<1x100x96xf32> to vector<100x96xf32>
    %cst_12 = arith.constant dense<0.000000e+00> : vector<256x96xf32>
    %31 = tpu.matmul %7, %30, %cst_12 {dimension_numbers = #tpu.dot_dimension_numbers<[1], [0], [0], [1], [0, 0, 1, 1], [], []>} : vector<256x100xf32>, vector<100x96xf32>, vector<256x96xf32> -> vector<256x96xf32>
    %32 = arith.addf %28, %31 : vector<256x96xf32>
    %c3 = arith.constant 3 : index
    %c0_13 = arith.constant 0 : index
    %c0_14 = arith.constant 0 : index
    %33 = vector.load %arg3[%c3, %c0_13, %c0_14] : memref<9x100x96xf32, #tpu.memory_space<vmem>>, vector<1x100x96xf32>
    %34 = vector.shape_cast %33 : vector<1x100x96xf32> to vector<100x96xf32>
    %cst_15 = arith.constant dense<0.000000e+00> : vector<256x96xf32>
    %35 = tpu.matmul %9, %34, %cst_15 {dimension_numbers = #tpu.dot_dimension_numbers<[1], [0], [0], [1], [0, 0, 1, 1], [], []>} : vector<256x100xf32>, vector<100x96xf32>, vector<256x96xf32> -> vector<256x96xf32>
    %36 = arith.addf %32, %35 : vector<256x96xf32>
    %c4 = arith.constant 4 : index
    %c0_16 = arith.constant 0 : index
    %c0_17 = arith.constant 0 : index
    %37 = vector.load %arg3[%c4, %c0_16, %c0_17] : memref<9x100x96xf32, #tpu.memory_space<vmem>>, vector<1x100x96xf32>
    %38 = vector.shape_cast %37 : vector<1x100x96xf32> to vector<100x96xf32>
    %cst_18 = arith.constant dense<0.000000e+00> : vector<256x96xf32>
    %39 = tpu.matmul %11, %38, %cst_18 {dimension_numbers = #tpu.dot_dimension_numbers<[1], [0], [0], [1], [0, 0, 1, 1], [], []>} : vector<256x100xf32>, vector<100x96xf32>, vector<256x96xf32> -> vector<256x96xf32>
    %40 = arith.addf %36, %39 : vector<256x96xf32>
    %c5 = arith.constant 5 : index
    %c0_19 = arith.constant 0 : index
    %c0_20 = arith.constant 0 : index
    %41 = vector.load %arg3[%c5, %c0_19, %c0_20] : memref<9x100x96xf32, #tpu.memory_space<vmem>>, vector<1x100x96xf32>
    %42 = vector.shape_cast %41 : vector<1x100x96xf32> to vector<100x96xf32>
    %cst_21 = arith.constant dense<0.000000e+00> : vector<256x96xf32>
    %43 = tpu.matmul %13, %42, %cst_21 {dimension_numbers = #tpu.dot_dimension_numbers<[1], [0], [0], [1], [0, 0, 1, 1], [], []>} : vector<256x100xf32>, vector<100x96xf32>, vector<256x96xf32> -> vector<256x96xf32>
    %44 = arith.addf %40, %43 : vector<256x96xf32>
    %c6 = arith.constant 6 : index
    %c0_22 = arith.constant 0 : index
    %c0_23 = arith.constant 0 : index
    %45 = vector.load %arg3[%c6, %c0_22, %c0_23] : memref<9x100x96xf32, #tpu.memory_space<vmem>>, vector<1x100x96xf32>
    %46 = vector.shape_cast %45 : vector<1x100x96xf32> to vector<100x96xf32>
    %cst_24 = arith.constant dense<0.000000e+00> : vector<256x96xf32>
    %47 = tpu.matmul %15, %46, %cst_24 {dimension_numbers = #tpu.dot_dimension_numbers<[1], [0], [0], [1], [0, 0, 1, 1], [], []>} : vector<256x100xf32>, vector<100x96xf32>, vector<256x96xf32> -> vector<256x96xf32>
    %48 = arith.addf %44, %47 : vector<256x96xf32>
    %c7 = arith.constant 7 : index
    %c0_25 = arith.constant 0 : index
    %c0_26 = arith.constant 0 : index
    %49 = vector.load %arg3[%c7, %c0_25, %c0_26] : memref<9x100x96xf32, #tpu.memory_space<vmem>>, vector<1x100x96xf32>
    %50 = vector.shape_cast %49 : vector<1x100x96xf32> to vector<100x96xf32>
    %cst_27 = arith.constant dense<0.000000e+00> : vector<256x96xf32>
    %51 = tpu.matmul %17, %50, %cst_27 {dimension_numbers = #tpu.dot_dimension_numbers<[1], [0], [0], [1], [0, 0, 1, 1], [], []>} : vector<256x100xf32>, vector<100x96xf32>, vector<256x96xf32> -> vector<256x96xf32>
    %52 = arith.addf %48, %51 : vector<256x96xf32>
    %c8 = arith.constant 8 : index
    %c0_28 = arith.constant 0 : index
    %c0_29 = arith.constant 0 : index
    %53 = vector.load %arg3[%c8, %c0_28, %c0_29] : memref<9x100x96xf32, #tpu.memory_space<vmem>>, vector<1x100x96xf32>
    %54 = vector.shape_cast %53 : vector<1x100x96xf32> to vector<100x96xf32>
    %cst_30 = arith.constant dense<0.000000e+00> : vector<256x96xf32>
    %55 = tpu.matmul %19, %54, %cst_30 {dimension_numbers = #tpu.dot_dimension_numbers<[1], [0], [0], [1], [0, 0, 1, 1], [], []>} : vector<256x100xf32>, vector<100x96xf32>, vector<256x96xf32> -> vector<256x96xf32>
    %56 = arith.addf %52, %55 : vector<256x96xf32>
    %c0_31 = arith.constant 0 : index
    %c0_32 = arith.constant 0 : index
    %57 = vector.load %arg4[%c0_31, %c0_32] : memref<1x96xf32, #tpu.memory_space<vmem>>, vector<1x96xf32>
    %58 = vector.broadcast %57 : vector<1x96xf32> to vector<256x96xf32>
    %59 = arith.addf %56, %58 : vector<256x96xf32>
    %cst_33 = arith.constant 0.000000e+00 : f32
    %60 = vector.broadcast %cst_33 : f32 to vector<256x96xf32>
    %61 = arith.cmpf oge, %59, %60 : vector<256x96xf32>
    %cst_34 = arith.constant 1.000000e-01 : f32
    %62 = vector.broadcast %cst_34 : f32 to vector<256x96xf32>
    %63 = arith.mulf %62, %59 : vector<256x96xf32>
    %64 = arith.select %61, %59, %63 : vector<256x96xi1>, vector<256x96xf32>
    %c0_35 = arith.constant 0 : index
    %c0_36 = arith.constant 0 : index
    %65 = vector.load %arg5[%c0_35, %c0_36] : memref<96x144xf32, #tpu.memory_space<vmem>>, vector<96x144xf32>
    %cst_37 = arith.constant dense<0.000000e+00> : vector<256x144xf32>
    %66 = tpu.matmul %64, %65, %cst_37 {dimension_numbers = #tpu.dot_dimension_numbers<[1], [0], [0], [1], [0, 0, 1, 1], [], []>} : vector<256x96xf32>, vector<96x144xf32>, vector<256x144xf32> -> vector<256x144xf32>
    %c0_38 = arith.constant 0 : index
    %c0_39 = arith.constant 0 : index
    %67 = vector.load %arg6[%c0_38, %c0_39] : memref<1x144xf32, #tpu.memory_space<vmem>>, vector<1x144xf32>
    %68 = vector.broadcast %67 : vector<1x144xf32> to vector<256x144xf32>
    %69 = arith.addf %66, %68 : vector<256x144xf32>
    %c0_40 = arith.constant 0 : index
    %c0_41 = arith.constant 0 : index
    %c0_42 = arith.constant 0 : index
    %70 = vector.load %arg7[%c0_40, %c0_41, %c0_42] : memref<1x256x144xf32, #tpu.memory_space<vmem>>, vector<1x256x144xf32>
    %71 = vector.shape_cast %70 : vector<1x256x144xf32> to vector<256x144xf32>
    %72 = vector.shape_cast %69 : vector<256x144xf32> to vector<1x256x144xf32>
    tpu.vector_store %arg7[%c0_40, %c0_41, %c0_42], %72 {strides = array<i32>} : memref<1x256x144xf32, #tpu.memory_space<vmem>>, vector<1x256x144xf32>,
    return
  }
  func.func @transform_0(%arg0: i32, %arg1: i32) -> (i32, i32, i32, i32) {
    %c0_i32 = arith.constant 0 : i32
    %c0_i32_0 = arith.constant 0 : i32
    %c0_i32_1 = arith.constant 0 : i32
    %c0_i32_2 = arith.constant 0 : i32
    return %arg0, %c0_i32, %c0_i32_0, %c0_i32_1 : i32, i32, i32, i32
  }
  func.func @transform_1(%arg0: i32, %arg1: i32) -> (i32, i32, i32) {
    %c0_i32 = arith.constant 0 : i32
    %c0_i32_0 = arith.constant 0 : i32
    %c0_i32_1 = arith.constant 0 : i32
    %c0_i32_2 = arith.constant 0 : i32
    return %c0_i32, %c0_i32_0, %c0_i32_1 : i32, i32, i32
  }
  func.func @transform_2(%arg0: i32, %arg1: i32) -> (i32, i32) {
    %c0_i32 = arith.constant 0 : i32
    %c0_i32_0 = arith.constant 0 : i32
    %c0_i32_1 = arith.constant 0 : i32
    return %c0_i32, %c0_i32_0 : i32, i32
  }
  func.func @transform_3(%arg0: i32, %arg1: i32) -> (i32, i32) {
    %c0_i32 = arith.constant 0 : i32
    %c0_i32_0 = arith.constant 0 : i32
    %c0_i32_1 = arith.constant 0 : i32
    return %c0_i32, %c0_i32_0 : i32, i32
  }
  func.func @transform_4(%arg0: i32, %arg1: i32) -> (i32, i32) {
    %c0_i32 = arith.constant 0 : i32
    %c0_i32_0 = arith.constant 0 : i32
    %c0_i32_1 = arith.constant 0 : i32
    return %c0_i32, %c0_i32_0 : i32, i32
  }
  func.func @transform_5(%arg0: i32, %arg1: i32) -> (i32, i32, i32) {
    %c0_i32 = arith.constant 0 : i32
    %c0_i32_0 = arith.constant 0 : i32
    return %arg0, %arg1, %c0_i32 : i32, i32, i32
  }
}

module attributes {stable_mosaic.version = 11 : i64} {
  func.func @kernel(%arg0: i32, %arg1: i32, %arg2: memref<1x18x18x96xf32, #tpu.memory_space<vmem>>, %arg3: memref<9x96x96xf32, #tpu.memory_space<vmem>>, %arg4: memref<1x96xf32, #tpu.memory_space<vmem>>, %arg5: memref<96x96xf32, #tpu.memory_space<vmem>>, %arg6: memref<1x96xf32, #tpu.memory_space<vmem>>, %arg7: memref<1x256x96xf32, #tpu.memory_space<vmem>>) attributes {dimension_semantics = [#tpu.dimension_semantics<parallel>, #tpu.dimension_semantics<parallel>], iteration_bounds = array<i64: 2, 1>, scalar_prefetch = 0 : i64, scratch_operands = 0 : i64, tpu.core_type = #tpu.core_type<tc>, window_params = [{transform_indices = @transform_0, window_bounds = array<i64: 1, 18, 18, 96>}, {pipeline_mode = #tpu.pipeline_mode<synchronous>, transform_indices = @transform_1, window_bounds = array<i64: 9, 96, 96>}, {pipeline_mode = #tpu.pipeline_mode<synchronous>, transform_indices = @transform_2, window_bounds = array<i64: 1, 96>}, {pipeline_mode = #tpu.pipeline_mode<synchronous>, transform_indices = @transform_3, window_bounds = array<i64: 96, 96>}, {pipeline_mode = #tpu.pipeline_mode<synchronous>, transform_indices = @transform_4, window_bounds = array<i64: 1, 96>}, {transform_indices = @transform_5, window_bounds = array<i64: 1, 256, 96>}]} {
    %c0 = arith.constant 0 : index
    %c0_0 = arith.constant 0 : index
    %c0_1 = arith.constant 0 : index
    %c0_2 = arith.constant 0 : index
    %0 = vector.load %arg2[%c0, %c0_0, %c0_1, %c0_2] : memref<1x18x18x96xf32, #tpu.memory_space<vmem>>, vector<1x18x18x96xf32>
    %1 = vector.shape_cast %0 : vector<1x18x18x96xf32> to vector<18x18x96xf32>
    %2 = vector.extract_strided_slice %1 {offsets = [0, 0, 0], sizes = [16, 16, 96], strides = [1, 1, 1]} : vector<18x18x96xf32> to vector<16x16x96xf32>
    %3 = vector.shape_cast %2 : vector<16x16x96xf32> to vector<256x96xf32>
    %4 = vector.extract_strided_slice %1 {offsets = [0, 1, 0], sizes = [16, 16, 96], strides = [1, 1, 1]} : vector<18x18x96xf32> to vector<16x16x96xf32>
    %5 = vector.shape_cast %4 : vector<16x16x96xf32> to vector<256x96xf32>
    %6 = vector.extract_strided_slice %1 {offsets = [0, 2, 0], sizes = [16, 16, 96], strides = [1, 1, 1]} : vector<18x18x96xf32> to vector<16x16x96xf32>
    %7 = vector.shape_cast %6 : vector<16x16x96xf32> to vector<256x96xf32>
    %8 = vector.extract_strided_slice %1 {offsets = [1, 0, 0], sizes = [16, 16, 96], strides = [1, 1, 1]} : vector<18x18x96xf32> to vector<16x16x96xf32>
    %9 = vector.shape_cast %8 : vector<16x16x96xf32> to vector<256x96xf32>
    %10 = vector.extract_strided_slice %1 {offsets = [1, 1, 0], sizes = [16, 16, 96], strides = [1, 1, 1]} : vector<18x18x96xf32> to vector<16x16x96xf32>
    %11 = vector.shape_cast %10 : vector<16x16x96xf32> to vector<256x96xf32>
    %12 = vector.extract_strided_slice %1 {offsets = [1, 2, 0], sizes = [16, 16, 96], strides = [1, 1, 1]} : vector<18x18x96xf32> to vector<16x16x96xf32>
    %13 = vector.shape_cast %12 : vector<16x16x96xf32> to vector<256x96xf32>
    %14 = vector.extract_strided_slice %1 {offsets = [2, 0, 0], sizes = [16, 16, 96], strides = [1, 1, 1]} : vector<18x18x96xf32> to vector<16x16x96xf32>
    %15 = vector.shape_cast %14 : vector<16x16x96xf32> to vector<256x96xf32>
    %16 = vector.extract_strided_slice %1 {offsets = [2, 1, 0], sizes = [16, 16, 96], strides = [1, 1, 1]} : vector<18x18x96xf32> to vector<16x16x96xf32>
    %17 = vector.shape_cast %16 : vector<16x16x96xf32> to vector<256x96xf32>
    %18 = vector.extract_strided_slice %1 {offsets = [2, 2, 0], sizes = [16, 16, 96], strides = [1, 1, 1]} : vector<18x18x96xf32> to vector<16x16x96xf32>
    %19 = vector.shape_cast %18 : vector<16x16x96xf32> to vector<256x96xf32>
    %cst = arith.constant 0.000000e+00 : f32
    %20 = vector.broadcast %cst : f32 to vector<256x96xf32>
    %c0_3 = arith.constant 0 : index
    %c0_4 = arith.constant 0 : index
    %c0_5 = arith.constant 0 : index
    %21 = vector.load %arg3[%c0_3, %c0_4, %c0_5] : memref<9x96x96xf32, #tpu.memory_space<vmem>>, vector<1x96x96xf32>
    %22 = vector.shape_cast %21 : vector<1x96x96xf32> to vector<96x96xf32>
    %cst_6 = arith.constant dense<0.000000e+00> : vector<256x96xf32>
    %23 = tpu.matmul %3, %22, %cst_6 {dimension_numbers = #tpu.dot_dimension_numbers<[1], [0], [0], [1], [0, 0, 1, 1], [], []>} : vector<256x96xf32>, vector<96x96xf32>, vector<256x96xf32> -> vector<256x96xf32>
    %24 = arith.addf %20, %23 : vector<256x96xf32>
    %c1 = arith.constant 1 : index
    %c0_7 = arith.constant 0 : index
    %c0_8 = arith.constant 0 : index
    %25 = vector.load %arg3[%c1, %c0_7, %c0_8] : memref<9x96x96xf32, #tpu.memory_space<vmem>>, vector<1x96x96xf32>
    %26 = vector.shape_cast %25 : vector<1x96x96xf32> to vector<96x96xf32>
    %cst_9 = arith.constant dense<0.000000e+00> : vector<256x96xf32>
    %27 = tpu.matmul %5, %26, %cst_9 {dimension_numbers = #tpu.dot_dimension_numbers<[1], [0], [0], [1], [0, 0, 1, 1], [], []>} : vector<256x96xf32>, vector<96x96xf32>, vector<256x96xf32> -> vector<256x96xf32>
    %28 = arith.addf %24, %27 : vector<256x96xf32>
    %c2 = arith.constant 2 : index
    %c0_10 = arith.constant 0 : index
    %c0_11 = arith.constant 0 : index
    %29 = vector.load %arg3[%c2, %c0_10, %c0_11] : memref<9x96x96xf32, #tpu.memory_space<vmem>>, vector<1x96x96xf32>
    %30 = vector.shape_cast %29 : vector<1x96x96xf32> to vector<96x96xf32>
    %cst_12 = arith.constant dense<0.000000e+00> : vector<256x96xf32>
    %31 = tpu.matmul %7, %30, %cst_12 {dimension_numbers = #tpu.dot_dimension_numbers<[1], [0], [0], [1], [0, 0, 1, 1], [], []>} : vector<256x96xf32>, vector<96x96xf32>, vector<256x96xf32> -> vector<256x96xf32>
    %32 = arith.addf %28, %31 : vector<256x96xf32>
    %c3 = arith.constant 3 : index
    %c0_13 = arith.constant 0 : index
    %c0_14 = arith.constant 0 : index
    %33 = vector.load %arg3[%c3, %c0_13, %c0_14] : memref<9x96x96xf32, #tpu.memory_space<vmem>>, vector<1x96x96xf32>
    %34 = vector.shape_cast %33 : vector<1x96x96xf32> to vector<96x96xf32>
    %cst_15 = arith.constant dense<0.000000e+00> : vector<256x96xf32>
    %35 = tpu.matmul %9, %34, %cst_15 {dimension_numbers = #tpu.dot_dimension_numbers<[1], [0], [0], [1], [0, 0, 1, 1], [], []>} : vector<256x96xf32>, vector<96x96xf32>, vector<256x96xf32> -> vector<256x96xf32>
    %36 = arith.addf %32, %35 : vector<256x96xf32>
    %c4 = arith.constant 4 : index
    %c0_16 = arith.constant 0 : index
    %c0_17 = arith.constant 0 : index
    %37 = vector.load %arg3[%c4, %c0_16, %c0_17] : memref<9x96x96xf32, #tpu.memory_space<vmem>>, vector<1x96x96xf32>
    %38 = vector.shape_cast %37 : vector<1x96x96xf32> to vector<96x96xf32>
    %cst_18 = arith.constant dense<0.000000e+00> : vector<256x96xf32>
    %39 = tpu.matmul %11, %38, %cst_18 {dimension_numbers = #tpu.dot_dimension_numbers<[1], [0], [0], [1], [0, 0, 1, 1], [], []>} : vector<256x96xf32>, vector<96x96xf32>, vector<256x96xf32> -> vector<256x96xf32>
    %40 = arith.addf %36, %39 : vector<256x96xf32>
    %c5 = arith.constant 5 : index
    %c0_19 = arith.constant 0 : index
    %c0_20 = arith.constant 0 : index
    %41 = vector.load %arg3[%c5, %c0_19, %c0_20] : memref<9x96x96xf32, #tpu.memory_space<vmem>>, vector<1x96x96xf32>
    %42 = vector.shape_cast %41 : vector<1x96x96xf32> to vector<96x96xf32>
    %cst_21 = arith.constant dense<0.000000e+00> : vector<256x96xf32>
    %43 = tpu.matmul %13, %42, %cst_21 {dimension_numbers = #tpu.dot_dimension_numbers<[1], [0], [0], [1], [0, 0, 1, 1], [], []>} : vector<256x96xf32>, vector<96x96xf32>, vector<256x96xf32> -> vector<256x96xf32>
    %44 = arith.addf %40, %43 : vector<256x96xf32>
    %c6 = arith.constant 6 : index
    %c0_22 = arith.constant 0 : index
    %c0_23 = arith.constant 0 : index
    %45 = vector.load %arg3[%c6, %c0_22, %c0_23] : memref<9x96x96xf32, #tpu.memory_space<vmem>>, vector<1x96x96xf32>
    %46 = vector.shape_cast %45 : vector<1x96x96xf32> to vector<96x96xf32>
    %cst_24 = arith.constant dense<0.000000e+00> : vector<256x96xf32>
    %47 = tpu.matmul %15, %46, %cst_24 {dimension_numbers = #tpu.dot_dimension_numbers<[1], [0], [0], [1], [0, 0, 1, 1], [], []>} : vector<256x96xf32>, vector<96x96xf32>, vector<256x96xf32> -> vector<256x96xf32>
    %48 = arith.addf %44, %47 : vector<256x96xf32>
    %c7 = arith.constant 7 : index
    %c0_25 = arith.constant 0 : index
    %c0_26 = arith.constant 0 : index
    %49 = vector.load %arg3[%c7, %c0_25, %c0_26] : memref<9x96x96xf32, #tpu.memory_space<vmem>>, vector<1x96x96xf32>
    %50 = vector.shape_cast %49 : vector<1x96x96xf32> to vector<96x96xf32>
    %cst_27 = arith.constant dense<0.000000e+00> : vector<256x96xf32>
    %51 = tpu.matmul %17, %50, %cst_27 {dimension_numbers = #tpu.dot_dimension_numbers<[1], [0], [0], [1], [0, 0, 1, 1], [], []>} : vector<256x96xf32>, vector<96x96xf32>, vector<256x96xf32> -> vector<256x96xf32>
    %52 = arith.addf %48, %51 : vector<256x96xf32>
    %c8 = arith.constant 8 : index
    %c0_28 = arith.constant 0 : index
    %c0_29 = arith.constant 0 : index
    %53 = vector.load %arg3[%c8, %c0_28, %c0_29] : memref<9x96x96xf32, #tpu.memory_space<vmem>>, vector<1x96x96xf32>
    %54 = vector.shape_cast %53 : vector<1x96x96xf32> to vector<96x96xf32>
    %cst_30 = arith.constant dense<0.000000e+00> : vector<256x96xf32>
    %55 = tpu.matmul %19, %54, %cst_30 {dimension_numbers = #tpu.dot_dimension_numbers<[1], [0], [0], [1], [0, 0, 1, 1], [], []>} : vector<256x96xf32>, vector<96x96xf32>, vector<256x96xf32> -> vector<256x96xf32>
    %56 = arith.addf %52, %55 : vector<256x96xf32>
    %c0_31 = arith.constant 0 : index
    %c0_32 = arith.constant 0 : index
    %57 = vector.load %arg4[%c0_31, %c0_32] : memref<1x96xf32, #tpu.memory_space<vmem>>, vector<1x96xf32>
    %58 = vector.broadcast %57 : vector<1x96xf32> to vector<256x96xf32>
    %59 = arith.addf %56, %58 : vector<256x96xf32>
    %cst_33 = arith.constant 0.000000e+00 : f32
    %60 = vector.broadcast %cst_33 : f32 to vector<256x96xf32>
    %61 = arith.cmpf oge, %59, %60 : vector<256x96xf32>
    %cst_34 = arith.constant 1.000000e-01 : f32
    %62 = vector.broadcast %cst_34 : f32 to vector<256x96xf32>
    %63 = arith.mulf %62, %59 : vector<256x96xf32>
    %64 = arith.select %61, %59, %63 : vector<256x96xi1>, vector<256x96xf32>
    %c0_35 = arith.constant 0 : index
    %c0_36 = arith.constant 0 : index
    %65 = vector.load %arg5[%c0_35, %c0_36] : memref<96x96xf32, #tpu.memory_space<vmem>>, vector<96x96xf32>
    %cst_37 = arith.constant dense<0.000000e+00> : vector<256x96xf32>
    %66 = tpu.matmul %64, %65, %cst_37 {dimension_numbers = #tpu.dot_dimension_numbers<[1], [0], [0], [1], [0, 0, 1, 1], [], []>} : vector<256x96xf32>, vector<96x96xf32>, vector<256x96xf32> -> vector<256x96xf32>
    %c0_38 = arith.constant 0 : index
    %c0_39 = arith.constant 0 : index
    %67 = vector.load %arg6[%c0_38, %c0_39] : memref<1x96xf32, #tpu.memory_space<vmem>>, vector<1x96xf32>
    %68 = vector.broadcast %67 : vector<1x96xf32> to vector<256x96xf32>
    %69 = arith.addf %66, %68 : vector<256x96xf32>
    %c0_40 = arith.constant 0 : index
    %c0_41 = arith.constant 0 : index
    %c0_42 = arith.constant 0 : index
    %70 = vector.load %arg7[%c0_40, %c0_41, %c0_42] : memref<1x256x96xf32, #tpu.memory_space<vmem>>, vector<1x256x96xf32>
    %71 = vector.shape_cast %70 : vector<1x256x96xf32> to vector<256x96xf32>
    %72 = vector.shape_cast %69 : vector<256x96xf32> to vector<1x256x96xf32>
    tpu.vector_store %arg7[%c0_40, %c0_41, %c0_42], %72 {strides = array<i32>} : memref<1x256x96xf32, #tpu.memory_space<vmem>>, vector<1x256x96xf32>,
    return
  }
  func.func @transform_0(%arg0: i32, %arg1: i32) -> (i32, i32, i32, i32) {
    %c0_i32 = arith.constant 0 : i32
    %c0_i32_0 = arith.constant 0 : i32
    %c0_i32_1 = arith.constant 0 : i32
    %c0_i32_2 = arith.constant 0 : i32
    return %arg0, %c0_i32, %c0_i32_0, %c0_i32_1 : i32, i32, i32, i32
  }
  func.func @transform_1(%arg0: i32, %arg1: i32) -> (i32, i32, i32) {
    %c0_i32 = arith.constant 0 : i32
    %c0_i32_0 = arith.constant 0 : i32
    %c0_i32_1 = arith.constant 0 : i32
    %c0_i32_2 = arith.constant 0 : i32
    return %c0_i32, %c0_i32_0, %c0_i32_1 : i32, i32, i32
  }
  func.func @transform_2(%arg0: i32, %arg1: i32) -> (i32, i32) {
    %c0_i32 = arith.constant 0 : i32
    %c0_i32_0 = arith.constant 0 : i32
    %c0_i32_1 = arith.constant 0 : i32
    return %c0_i32, %c0_i32_0 : i32, i32
  }
  func.func @transform_3(%arg0: i32, %arg1: i32) -> (i32, i32) {
    %c0_i32 = arith.constant 0 : i32
    %c0_i32_0 = arith.constant 0 : i32
    %c0_i32_1 = arith.constant 0 : i32
    return %c0_i32, %c0_i32_0 : i32, i32
  }
  func.func @transform_4(%arg0: i32, %arg1: i32) -> (i32, i32) {
    %c0_i32 = arith.constant 0 : i32
    %c0_i32_0 = arith.constant 0 : i32
    %c0_i32_1 = arith.constant 0 : i32
    return %c0_i32, %c0_i32_0 : i32, i32
  }
  func.func @transform_5(%arg0: i32, %arg1: i32) -> (i32, i32, i32) {
    %c0_i32 = arith.constant 0 : i32
    %c0_i32_0 = arith.constant 0 : i32
    return %arg0, %arg1, %c0_i32 : i32, i32, i32
  }
}

module attributes {stable_mosaic.version = 11 : i64} {
  func.func @kernel(%arg0: i32, %arg1: i32, %arg2: memref<1x256x48xf32, #tpu.memory_space<vmem>>, %arg3: memref<1x256x384xf32, #tpu.memory_space<vmem>>, %arg4: memref<48x48xf32, #tpu.memory_space<vmem>>, %arg5: memref<48x384xf32, #tpu.memory_space<vmem>>, %arg6: memref<384x32xf32, #tpu.memory_space<vmem>>, %arg7: memref<1x32xf32, #tpu.memory_space<vmem>>, %arg8: memref<1x256x32xf32, #tpu.memory_space<vmem>>) attributes {dimension_semantics = [#tpu.dimension_semantics<parallel>, #tpu.dimension_semantics<parallel>], iteration_bounds = array<i64: 2, 1>, scalar_prefetch = 0 : i64, scratch_operands = 0 : i64, tpu.core_type = #tpu.core_type<tc>, window_params = [{transform_indices = @transform_0, window_bounds = array<i64: 1, 256, 48>}, {transform_indices = @transform_1, window_bounds = array<i64: 1, 256, 384>}, {pipeline_mode = #tpu.pipeline_mode<synchronous>, transform_indices = @transform_2, window_bounds = array<i64: 48, 48>}, {pipeline_mode = #tpu.pipeline_mode<synchronous>, transform_indices = @transform_3, window_bounds = array<i64: 48, 384>}, {pipeline_mode = #tpu.pipeline_mode<synchronous>, transform_indices = @transform_4, window_bounds = array<i64: 384, 32>}, {pipeline_mode = #tpu.pipeline_mode<synchronous>, transform_indices = @transform_5, window_bounds = array<i64: 1, 32>}, {transform_indices = @transform_6, window_bounds = array<i64: 1, 256, 32>}]} {
    %c0 = arith.constant 0 : index
    %c0_0 = arith.constant 0 : index
    %c0_1 = arith.constant 0 : index
    %0 = vector.load %arg2[%c0, %c0_0, %c0_1] : memref<1x256x48xf32, #tpu.memory_space<vmem>>, vector<1x256x48xf32>
    %1 = vector.shape_cast %0 : vector<1x256x48xf32> to vector<256x48xf32>
    %cst = arith.constant dense<0xFF800000> : vector<256xf32>
    %2 = vector.multi_reduction <maximumf>, %1, %cst [1] : vector<256x48xf32> to vector<256xf32>
    %3 = vector.shape_cast %2 : vector<256xf32> to vector<256x1xf32>
    %4 = vector.broadcast %3 : vector<256x1xf32> to vector<256x48xf32>
    %5 = arith.subf %1, %4 : vector<256x48xf32>
    %6 = math.exp %5 : vector<256x48xf32>
    %c0_2 = arith.constant 0 : index
    %c0_3 = arith.constant 0 : index
    %7 = vector.load %arg4[%c0_2, %c0_3] : memref<48x48xf32, #tpu.memory_space<vmem>>, vector<48x48xf32>
    %cst_4 = arith.constant dense<0.000000e+00> : vector<256x48xf32>
    %8 = tpu.matmul %6, %7, %cst_4 {dimension_numbers = #tpu.dot_dimension_numbers<[1], [0], [0], [1], [0, 0, 1, 1], [], []>} : vector<256x48xf32>, vector<48x48xf32>, vector<256x48xf32> -> vector<256x48xf32>
    %cst_5 = arith.constant 9.99999968E-21 : f32
    %9 = vector.broadcast %cst_5 : f32 to vector<256x48xf32>
    %10 = arith.maximumf %8, %9 : vector<256x48xf32>
    %11 = arith.divf %6, %10 : vector<256x48xf32>
    %c0_6 = arith.constant 0 : index
    %c0_7 = arith.constant 0 : index
    %12 = vector.load %arg5[%c0_6, %c0_7] : memref<48x384xf32, #tpu.memory_space<vmem>>, vector<48x384xf32>
    %cst_8 = arith.constant dense<0.000000e+00> : vector<256x384xf32>
    %13 = tpu.matmul %11, %12, %cst_8 {dimension_numbers = #tpu.dot_dimension_numbers<[1], [0], [0], [1], [0, 0, 1, 1], [], []>} : vector<256x48xf32>, vector<48x384xf32>, vector<256x384xf32> -> vector<256x384xf32>
    %c0_9 = arith.constant 0 : index
    %c0_10 = arith.constant 0 : index
    %c0_11 = arith.constant 0 : index
    %14 = vector.load %arg3[%c0_9, %c0_10, %c0_11] : memref<1x256x384xf32, #tpu.memory_space<vmem>>, vector<1x256x384xf32>
    %15 = vector.shape_cast %14 : vector<1x256x384xf32> to vector<256x384xf32>
    %16 = arith.mulf %13, %15 : vector<256x384xf32>
    %c0_12 = arith.constant 0 : index
    %c0_13 = arith.constant 0 : index
    %17 = vector.load %arg6[%c0_12, %c0_13] : memref<384x32xf32, #tpu.memory_space<vmem>>, vector<384x32xf32>
    %cst_14 = arith.constant dense<0.000000e+00> : vector<256x32xf32>
    %18 = tpu.matmul %16, %17, %cst_14 {dimension_numbers = #tpu.dot_dimension_numbers<[1], [0], [0], [1], [0, 0, 1, 1], [], []>} : vector<256x384xf32>, vector<384x32xf32>, vector<256x32xf32> -> vector<256x32xf32>
    %c0_15 = arith.constant 0 : index
    %c0_16 = arith.constant 0 : index
    %19 = vector.load %arg7[%c0_15, %c0_16] : memref<1x32xf32, #tpu.memory_space<vmem>>, vector<1x32xf32>
    %20 = vector.broadcast %19 : vector<1x32xf32> to vector<256x32xf32>
    %21 = arith.addf %18, %20 : vector<256x32xf32>
    %c0_17 = arith.constant 0 : index
    %c0_18 = arith.constant 0 : index
    %c0_19 = arith.constant 0 : index
    %22 = vector.load %arg8[%c0_17, %c0_18, %c0_19] : memref<1x256x32xf32, #tpu.memory_space<vmem>>, vector<1x256x32xf32>
    %23 = vector.shape_cast %22 : vector<1x256x32xf32> to vector<256x32xf32>
    %24 = vector.shape_cast %21 : vector<256x32xf32> to vector<1x256x32xf32>
    tpu.vector_store %arg8[%c0_17, %c0_18, %c0_19], %24 {strides = array<i32>} : memref<1x256x32xf32, #tpu.memory_space<vmem>>, vector<1x256x32xf32>,
    return
  }
  func.func @transform_0(%arg0: i32, %arg1: i32) -> (i32, i32, i32) {
    %c0_i32 = arith.constant 0 : i32
    %c0_i32_0 = arith.constant 0 : i32
    return %arg0, %arg1, %c0_i32 : i32, i32, i32
  }
  func.func @transform_1(%arg0: i32, %arg1: i32) -> (i32, i32, i32) {
    %c0_i32 = arith.constant 0 : i32
    %c0_i32_0 = arith.constant 0 : i32
    return %arg0, %arg1, %c0_i32 : i32, i32, i32
  }
  func.func @transform_2(%arg0: i32, %arg1: i32) -> (i32, i32) {
    %c0_i32 = arith.constant 0 : i32
    %c0_i32_0 = arith.constant 0 : i32
    %c0_i32_1 = arith.constant 0 : i32
    return %c0_i32, %c0_i32_0 : i32, i32
  }
  func.func @transform_3(%arg0: i32, %arg1: i32) -> (i32, i32) {
    %c0_i32 = arith.constant 0 : i32
    %c0_i32_0 = arith.constant 0 : i32
    %c0_i32_1 = arith.constant 0 : i32
    return %c0_i32, %c0_i32_0 : i32, i32
  }
  func.func @transform_4(%arg0: i32, %arg1: i32) -> (i32, i32) {
    %c0_i32 = arith.constant 0 : i32
    %c0_i32_0 = arith.constant 0 : i32
    %c0_i32_1 = arith.constant 0 : i32
    return %c0_i32, %c0_i32_0 : i32, i32
  }
  func.func @transform_5(%arg0: i32, %arg1: i32) -> (i32, i32) {
    %c0_i32 = arith.constant 0 : i32
    %c0_i32_0 = arith.constant 0 : i32
    %c0_i32_1 = arith.constant 0 : i32
    return %c0_i32, %c0_i32_0 : i32, i32
  }
  func.func @transform_6(%arg0: i32, %arg1: i32) -> (i32, i32, i32) {
    %c0_i32 = arith.constant 0 : i32
    %c0_i32_0 = arith.constant 0 : i32
    return %arg0, %arg1, %c0_i32 : i32, i32, i32
  }
}

module attributes {stable_mosaic.version = 11 : i64} {
  func.func @kernel(%arg0: i32, %arg1: i32, %arg2: memref<1x18x18x32xf32, #tpu.memory_space<vmem>>, %arg3: memref<9x32x32xf32, #tpu.memory_space<vmem>>, %arg4: memref<1x32xf32, #tpu.memory_space<vmem>>, %arg5: memref<1x256x32xf32, #tpu.memory_space<vmem>>, %arg6: memref<1x256x32xf32, #tpu.memory_space<vmem>>) attributes {dimension_semantics = [#tpu.dimension_semantics<parallel>, #tpu.dimension_semantics<parallel>], iteration_bounds = array<i64: 2, 1>, scalar_prefetch = 0 : i64, scratch_operands = 0 : i64, tpu.core_type = #tpu.core_type<tc>, window_params = [{transform_indices = @transform_0, window_bounds = array<i64: 1, 18, 18, 32>}, {pipeline_mode = #tpu.pipeline_mode<synchronous>, transform_indices = @transform_1, window_bounds = array<i64: 9, 32, 32>}, {pipeline_mode = #tpu.pipeline_mode<synchronous>, transform_indices = @transform_2, window_bounds = array<i64: 1, 32>}, {transform_indices = @transform_3, window_bounds = array<i64: 1, 256, 32>}, {transform_indices = @transform_4, window_bounds = array<i64: 1, 256, 32>}]} {
    %c0 = arith.constant 0 : index
    %c0_0 = arith.constant 0 : index
    %c0_1 = arith.constant 0 : index
    %c0_2 = arith.constant 0 : index
    %0 = vector.load %arg2[%c0, %c0_0, %c0_1, %c0_2] : memref<1x18x18x32xf32, #tpu.memory_space<vmem>>, vector<1x18x18x32xf32>
    %1 = vector.shape_cast %0 : vector<1x18x18x32xf32> to vector<18x18x32xf32>
    %2 = vector.extract_strided_slice %1 {offsets = [0, 0, 0], sizes = [16, 16, 32], strides = [1, 1, 1]} : vector<18x18x32xf32> to vector<16x16x32xf32>
    %3 = vector.shape_cast %2 : vector<16x16x32xf32> to vector<256x32xf32>
    %4 = vector.extract_strided_slice %1 {offsets = [0, 1, 0], sizes = [16, 16, 32], strides = [1, 1, 1]} : vector<18x18x32xf32> to vector<16x16x32xf32>
    %5 = vector.shape_cast %4 : vector<16x16x32xf32> to vector<256x32xf32>
    %6 = vector.extract_strided_slice %1 {offsets = [0, 2, 0], sizes = [16, 16, 32], strides = [1, 1, 1]} : vector<18x18x32xf32> to vector<16x16x32xf32>
    %7 = vector.shape_cast %6 : vector<16x16x32xf32> to vector<256x32xf32>
    %8 = vector.extract_strided_slice %1 {offsets = [1, 0, 0], sizes = [16, 16, 32], strides = [1, 1, 1]} : vector<18x18x32xf32> to vector<16x16x32xf32>
    %9 = vector.shape_cast %8 : vector<16x16x32xf32> to vector<256x32xf32>
    %10 = vector.extract_strided_slice %1 {offsets = [1, 1, 0], sizes = [16, 16, 32], strides = [1, 1, 1]} : vector<18x18x32xf32> to vector<16x16x32xf32>
    %11 = vector.shape_cast %10 : vector<16x16x32xf32> to vector<256x32xf32>
    %12 = vector.extract_strided_slice %1 {offsets = [1, 2, 0], sizes = [16, 16, 32], strides = [1, 1, 1]} : vector<18x18x32xf32> to vector<16x16x32xf32>
    %13 = vector.shape_cast %12 : vector<16x16x32xf32> to vector<256x32xf32>
    %14 = vector.extract_strided_slice %1 {offsets = [2, 0, 0], sizes = [16, 16, 32], strides = [1, 1, 1]} : vector<18x18x32xf32> to vector<16x16x32xf32>
    %15 = vector.shape_cast %14 : vector<16x16x32xf32> to vector<256x32xf32>
    %16 = vector.extract_strided_slice %1 {offsets = [2, 1, 0], sizes = [16, 16, 32], strides = [1, 1, 1]} : vector<18x18x32xf32> to vector<16x16x32xf32>
    %17 = vector.shape_cast %16 : vector<16x16x32xf32> to vector<256x32xf32>
    %18 = vector.extract_strided_slice %1 {offsets = [2, 2, 0], sizes = [16, 16, 32], strides = [1, 1, 1]} : vector<18x18x32xf32> to vector<16x16x32xf32>
    %19 = vector.shape_cast %18 : vector<16x16x32xf32> to vector<256x32xf32>
    %cst = arith.constant 0.000000e+00 : f32
    %20 = vector.broadcast %cst : f32 to vector<256x32xf32>
    %c0_3 = arith.constant 0 : index
    %c0_4 = arith.constant 0 : index
    %c0_5 = arith.constant 0 : index
    %21 = vector.load %arg3[%c0_3, %c0_4, %c0_5] : memref<9x32x32xf32, #tpu.memory_space<vmem>>, vector<1x32x32xf32>
    %22 = vector.shape_cast %21 : vector<1x32x32xf32> to vector<32x32xf32>
    %cst_6 = arith.constant dense<0.000000e+00> : vector<256x32xf32>
    %23 = tpu.matmul %3, %22, %cst_6 {dimension_numbers = #tpu.dot_dimension_numbers<[1], [0], [0], [1], [0, 0, 1, 1], [], []>} : vector<256x32xf32>, vector<32x32xf32>, vector<256x32xf32> -> vector<256x32xf32>
    %24 = arith.addf %20, %23 : vector<256x32xf32>
    %c1 = arith.constant 1 : index
    %c0_7 = arith.constant 0 : index
    %c0_8 = arith.constant 0 : index
    %25 = vector.load %arg3[%c1, %c0_7, %c0_8] : memref<9x32x32xf32, #tpu.memory_space<vmem>>, vector<1x32x32xf32>
    %26 = vector.shape_cast %25 : vector<1x32x32xf32> to vector<32x32xf32>
    %cst_9 = arith.constant dense<0.000000e+00> : vector<256x32xf32>
    %27 = tpu.matmul %5, %26, %cst_9 {dimension_numbers = #tpu.dot_dimension_numbers<[1], [0], [0], [1], [0, 0, 1, 1], [], []>} : vector<256x32xf32>, vector<32x32xf32>, vector<256x32xf32> -> vector<256x32xf32>
    %28 = arith.addf %24, %27 : vector<256x32xf32>
    %c2 = arith.constant 2 : index
    %c0_10 = arith.constant 0 : index
    %c0_11 = arith.constant 0 : index
    %29 = vector.load %arg3[%c2, %c0_10, %c0_11] : memref<9x32x32xf32, #tpu.memory_space<vmem>>, vector<1x32x32xf32>
    %30 = vector.shape_cast %29 : vector<1x32x32xf32> to vector<32x32xf32>
    %cst_12 = arith.constant dense<0.000000e+00> : vector<256x32xf32>
    %31 = tpu.matmul %7, %30, %cst_12 {dimension_numbers = #tpu.dot_dimension_numbers<[1], [0], [0], [1], [0, 0, 1, 1], [], []>} : vector<256x32xf32>, vector<32x32xf32>, vector<256x32xf32> -> vector<256x32xf32>
    %32 = arith.addf %28, %31 : vector<256x32xf32>
    %c3 = arith.constant 3 : index
    %c0_13 = arith.constant 0 : index
    %c0_14 = arith.constant 0 : index
    %33 = vector.load %arg3[%c3, %c0_13, %c0_14] : memref<9x32x32xf32, #tpu.memory_space<vmem>>, vector<1x32x32xf32>
    %34 = vector.shape_cast %33 : vector<1x32x32xf32> to vector<32x32xf32>
    %cst_15 = arith.constant dense<0.000000e+00> : vector<256x32xf32>
    %35 = tpu.matmul %9, %34, %cst_15 {dimension_numbers = #tpu.dot_dimension_numbers<[1], [0], [0], [1], [0, 0, 1, 1], [], []>} : vector<256x32xf32>, vector<32x32xf32>, vector<256x32xf32> -> vector<256x32xf32>
    %36 = arith.addf %32, %35 : vector<256x32xf32>
    %c4 = arith.constant 4 : index
    %c0_16 = arith.constant 0 : index
    %c0_17 = arith.constant 0 : index
    %37 = vector.load %arg3[%c4, %c0_16, %c0_17] : memref<9x32x32xf32, #tpu.memory_space<vmem>>, vector<1x32x32xf32>
    %38 = vector.shape_cast %37 : vector<1x32x32xf32> to vector<32x32xf32>
    %cst_18 = arith.constant dense<0.000000e+00> : vector<256x32xf32>
    %39 = tpu.matmul %11, %38, %cst_18 {dimension_numbers = #tpu.dot_dimension_numbers<[1], [0], [0], [1], [0, 0, 1, 1], [], []>} : vector<256x32xf32>, vector<32x32xf32>, vector<256x32xf32> -> vector<256x32xf32>
    %40 = arith.addf %36, %39 : vector<256x32xf32>
    %c5 = arith.constant 5 : index
    %c0_19 = arith.constant 0 : index
    %c0_20 = arith.constant 0 : index
    %41 = vector.load %arg3[%c5, %c0_19, %c0_20] : memref<9x32x32xf32, #tpu.memory_space<vmem>>, vector<1x32x32xf32>
    %42 = vector.shape_cast %41 : vector<1x32x32xf32> to vector<32x32xf32>
    %cst_21 = arith.constant dense<0.000000e+00> : vector<256x32xf32>
    %43 = tpu.matmul %13, %42, %cst_21 {dimension_numbers = #tpu.dot_dimension_numbers<[1], [0], [0], [1], [0, 0, 1, 1], [], []>} : vector<256x32xf32>, vector<32x32xf32>, vector<256x32xf32> -> vector<256x32xf32>
    %44 = arith.addf %40, %43 : vector<256x32xf32>
    %c6 = arith.constant 6 : index
    %c0_22 = arith.constant 0 : index
    %c0_23 = arith.constant 0 : index
    %45 = vector.load %arg3[%c6, %c0_22, %c0_23] : memref<9x32x32xf32, #tpu.memory_space<vmem>>, vector<1x32x32xf32>
    %46 = vector.shape_cast %45 : vector<1x32x32xf32> to vector<32x32xf32>
    %cst_24 = arith.constant dense<0.000000e+00> : vector<256x32xf32>
    %47 = tpu.matmul %15, %46, %cst_24 {dimension_numbers = #tpu.dot_dimension_numbers<[1], [0], [0], [1], [0, 0, 1, 1], [], []>} : vector<256x32xf32>, vector<32x32xf32>, vector<256x32xf32> -> vector<256x32xf32>
    %48 = arith.addf %44, %47 : vector<256x32xf32>
    %c7 = arith.constant 7 : index
    %c0_25 = arith.constant 0 : index
    %c0_26 = arith.constant 0 : index
    %49 = vector.load %arg3[%c7, %c0_25, %c0_26] : memref<9x32x32xf32, #tpu.memory_space<vmem>>, vector<1x32x32xf32>
    %50 = vector.shape_cast %49 : vector<1x32x32xf32> to vector<32x32xf32>
    %cst_27 = arith.constant dense<0.000000e+00> : vector<256x32xf32>
    %51 = tpu.matmul %17, %50, %cst_27 {dimension_numbers = #tpu.dot_dimension_numbers<[1], [0], [0], [1], [0, 0, 1, 1], [], []>} : vector<256x32xf32>, vector<32x32xf32>, vector<256x32xf32> -> vector<256x32xf32>
    %52 = arith.addf %48, %51 : vector<256x32xf32>
    %c8 = arith.constant 8 : index
    %c0_28 = arith.constant 0 : index
    %c0_29 = arith.constant 0 : index
    %53 = vector.load %arg3[%c8, %c0_28, %c0_29] : memref<9x32x32xf32, #tpu.memory_space<vmem>>, vector<1x32x32xf32>
    %54 = vector.shape_cast %53 : vector<1x32x32xf32> to vector<32x32xf32>
    %cst_30 = arith.constant dense<0.000000e+00> : vector<256x32xf32>
    %55 = tpu.matmul %19, %54, %cst_30 {dimension_numbers = #tpu.dot_dimension_numbers<[1], [0], [0], [1], [0, 0, 1, 1], [], []>} : vector<256x32xf32>, vector<32x32xf32>, vector<256x32xf32> -> vector<256x32xf32>
    %56 = arith.addf %52, %55 : vector<256x32xf32>
    %c0_31 = arith.constant 0 : index
    %c0_32 = arith.constant 0 : index
    %57 = vector.load %arg4[%c0_31, %c0_32] : memref<1x32xf32, #tpu.memory_space<vmem>>, vector<1x32xf32>
    %58 = vector.broadcast %57 : vector<1x32xf32> to vector<256x32xf32>
    %59 = arith.addf %56, %58 : vector<256x32xf32>
    %c0_33 = arith.constant 0 : index
    %c0_34 = arith.constant 0 : index
    %c0_35 = arith.constant 0 : index
    %60 = vector.load %arg5[%c0_33, %c0_34, %c0_35] : memref<1x256x32xf32, #tpu.memory_space<vmem>>, vector<1x256x32xf32>
    %61 = vector.shape_cast %60 : vector<1x256x32xf32> to vector<256x32xf32>
    %62 = arith.addf %59, %61 : vector<256x32xf32>
    %c0_36 = arith.constant 0 : index
    %c0_37 = arith.constant 0 : index
    %c0_38 = arith.constant 0 : index
    %63 = vector.load %arg6[%c0_36, %c0_37, %c0_38] : memref<1x256x32xf32, #tpu.memory_space<vmem>>, vector<1x256x32xf32>
    %64 = vector.shape_cast %63 : vector<1x256x32xf32> to vector<256x32xf32>
    %65 = vector.shape_cast %62 : vector<256x32xf32> to vector<1x256x32xf32>
    tpu.vector_store %arg6[%c0_36, %c0_37, %c0_38], %65 {strides = array<i32>} : memref<1x256x32xf32, #tpu.memory_space<vmem>>, vector<1x256x32xf32>,
    return
  }
  func.func @transform_0(%arg0: i32, %arg1: i32) -> (i32, i32, i32, i32) {
    %c0_i32 = arith.constant 0 : i32
    %c0_i32_0 = arith.constant 0 : i32
    %c0_i32_1 = arith.constant 0 : i32
    %c0_i32_2 = arith.constant 0 : i32
    return %arg0, %c0_i32, %c0_i32_0, %c0_i32_1 : i32, i32, i32, i32
  }
  func.func @transform_1(%arg0: i32, %arg1: i32) -> (i32, i32, i32) {
    %c0_i32 = arith.constant 0 : i32
    %c0_i32_0 = arith.constant 0 : i32
    %c0_i32_1 = arith.constant 0 : i32
    %c0_i32_2 = arith.constant 0 : i32
    return %c0_i32, %c0_i32_0, %c0_i32_1 : i32, i32, i32
  }
  func.func @transform_2(%arg0: i32, %arg1: i32) -> (i32, i32) {
    %c0_i32 = arith.constant 0 : i32
    %c0_i32_0 = arith.constant 0 : i32
    %c0_i32_1 = arith.constant 0 : i32
    return %c0_i32, %c0_i32_0 : i32, i32
  }
  func.func @transform_3(%arg0: i32, %arg1: i32) -> (i32, i32, i32) {
    %c0_i32 = arith.constant 0 : i32
    %c0_i32_0 = arith.constant 0 : i32
    return %arg0, %arg1, %c0_i32 : i32, i32, i32
  }
  func.func @transform_4(%arg0: i32, %arg1: i32) -> (i32, i32, i32) {
    %c0_i32 = arith.constant 0 : i32
    %c0_i32_0 = arith.constant 0 : i32
    return %arg0, %arg1, %c0_i32 : i32, i32, i32
  }
}

module attributes {stable_mosaic.version = 11 : i64} {
  func.func @kernel(%arg0: i32, %arg1: i32, %arg2: memref<1x20x20x64xf32, #tpu.memory_space<vmem>>, %arg3: memref<9x64x32xf32, #tpu.memory_space<vmem>>, %arg4: memref<1x32xf32, #tpu.memory_space<vmem>>, %arg5: memref<1x256x32xf32, #tpu.memory_space<vmem>>) attributes {dimension_semantics = [#tpu.dimension_semantics<parallel>, #tpu.dimension_semantics<parallel>], iteration_bounds = array<i64: 2, 1>, scalar_prefetch = 0 : i64, scratch_operands = 0 : i64, tpu.core_type = #tpu.core_type<tc>, window_params = [{transform_indices = @transform_0, window_bounds = array<i64: 1, 20, 20, 64>}, {pipeline_mode = #tpu.pipeline_mode<synchronous>, transform_indices = @transform_1, window_bounds = array<i64: 9, 64, 32>}, {pipeline_mode = #tpu.pipeline_mode<synchronous>, transform_indices = @transform_2, window_bounds = array<i64: 1, 32>}, {transform_indices = @transform_3, window_bounds = array<i64: 1, 256, 32>}]} {
    %c0 = arith.constant 0 : index
    %c0_0 = arith.constant 0 : index
    %c0_1 = arith.constant 0 : index
    %c0_2 = arith.constant 0 : index
    %0 = vector.load %arg2[%c0, %c0_0, %c0_1, %c0_2] : memref<1x20x20x64xf32, #tpu.memory_space<vmem>>, vector<1x20x20x64xf32>
    %1 = vector.shape_cast %0 : vector<1x20x20x64xf32> to vector<20x20x64xf32>
    %2 = vector.extract_strided_slice %1 {offsets = [0, 0, 0], sizes = [16, 16, 64], strides = [1, 1, 1]} : vector<20x20x64xf32> to vector<16x16x64xf32>
    %3 = vector.shape_cast %2 : vector<16x16x64xf32> to vector<256x64xf32>
    %4 = vector.extract_strided_slice %1 {offsets = [0, 2, 0], sizes = [16, 16, 64], strides = [1, 1, 1]} : vector<20x20x64xf32> to vector<16x16x64xf32>
    %5 = vector.shape_cast %4 : vector<16x16x64xf32> to vector<256x64xf32>
    %6 = vector.extract_strided_slice %1 {offsets = [0, 4, 0], sizes = [16, 16, 64], strides = [1, 1, 1]} : vector<20x20x64xf32> to vector<16x16x64xf32>
    %7 = vector.shape_cast %6 : vector<16x16x64xf32> to vector<256x64xf32>
    %8 = vector.extract_strided_slice %1 {offsets = [2, 0, 0], sizes = [16, 16, 64], strides = [1, 1, 1]} : vector<20x20x64xf32> to vector<16x16x64xf32>
    %9 = vector.shape_cast %8 : vector<16x16x64xf32> to vector<256x64xf32>
    %10 = vector.extract_strided_slice %1 {offsets = [2, 2, 0], sizes = [16, 16, 64], strides = [1, 1, 1]} : vector<20x20x64xf32> to vector<16x16x64xf32>
    %11 = vector.shape_cast %10 : vector<16x16x64xf32> to vector<256x64xf32>
    %12 = vector.extract_strided_slice %1 {offsets = [2, 4, 0], sizes = [16, 16, 64], strides = [1, 1, 1]} : vector<20x20x64xf32> to vector<16x16x64xf32>
    %13 = vector.shape_cast %12 : vector<16x16x64xf32> to vector<256x64xf32>
    %14 = vector.extract_strided_slice %1 {offsets = [4, 0, 0], sizes = [16, 16, 64], strides = [1, 1, 1]} : vector<20x20x64xf32> to vector<16x16x64xf32>
    %15 = vector.shape_cast %14 : vector<16x16x64xf32> to vector<256x64xf32>
    %16 = vector.extract_strided_slice %1 {offsets = [4, 2, 0], sizes = [16, 16, 64], strides = [1, 1, 1]} : vector<20x20x64xf32> to vector<16x16x64xf32>
    %17 = vector.shape_cast %16 : vector<16x16x64xf32> to vector<256x64xf32>
    %18 = vector.extract_strided_slice %1 {offsets = [4, 4, 0], sizes = [16, 16, 64], strides = [1, 1, 1]} : vector<20x20x64xf32> to vector<16x16x64xf32>
    %19 = vector.shape_cast %18 : vector<16x16x64xf32> to vector<256x64xf32>
    %cst = arith.constant 0.000000e+00 : f32
    %20 = vector.broadcast %cst : f32 to vector<256x32xf32>
    %c0_3 = arith.constant 0 : index
    %c0_4 = arith.constant 0 : index
    %c0_5 = arith.constant 0 : index
    %21 = vector.load %arg3[%c0_3, %c0_4, %c0_5] : memref<9x64x32xf32, #tpu.memory_space<vmem>>, vector<1x64x32xf32>
    %22 = vector.shape_cast %21 : vector<1x64x32xf32> to vector<64x32xf32>
    %cst_6 = arith.constant dense<0.000000e+00> : vector<256x32xf32>
    %23 = tpu.matmul %3, %22, %cst_6 {dimension_numbers = #tpu.dot_dimension_numbers<[1], [0], [0], [1], [0, 0, 1, 1], [], []>} : vector<256x64xf32>, vector<64x32xf32>, vector<256x32xf32> -> vector<256x32xf32>
    %24 = arith.addf %20, %23 : vector<256x32xf32>
    %c1 = arith.constant 1 : index
    %c0_7 = arith.constant 0 : index
    %c0_8 = arith.constant 0 : index
    %25 = vector.load %arg3[%c1, %c0_7, %c0_8] : memref<9x64x32xf32, #tpu.memory_space<vmem>>, vector<1x64x32xf32>
    %26 = vector.shape_cast %25 : vector<1x64x32xf32> to vector<64x32xf32>
    %cst_9 = arith.constant dense<0.000000e+00> : vector<256x32xf32>
    %27 = tpu.matmul %5, %26, %cst_9 {dimension_numbers = #tpu.dot_dimension_numbers<[1], [0], [0], [1], [0, 0, 1, 1], [], []>} : vector<256x64xf32>, vector<64x32xf32>, vector<256x32xf32> -> vector<256x32xf32>
    %28 = arith.addf %24, %27 : vector<256x32xf32>
    %c2 = arith.constant 2 : index
    %c0_10 = arith.constant 0 : index
    %c0_11 = arith.constant 0 : index
    %29 = vector.load %arg3[%c2, %c0_10, %c0_11] : memref<9x64x32xf32, #tpu.memory_space<vmem>>, vector<1x64x32xf32>
    %30 = vector.shape_cast %29 : vector<1x64x32xf32> to vector<64x32xf32>
    %cst_12 = arith.constant dense<0.000000e+00> : vector<256x32xf32>
    %31 = tpu.matmul %7, %30, %cst_12 {dimension_numbers = #tpu.dot_dimension_numbers<[1], [0], [0], [1], [0, 0, 1, 1], [], []>} : vector<256x64xf32>, vector<64x32xf32>, vector<256x32xf32> -> vector<256x32xf32>
    %32 = arith.addf %28, %31 : vector<256x32xf32>
    %c3 = arith.constant 3 : index
    %c0_13 = arith.constant 0 : index
    %c0_14 = arith.constant 0 : index
    %33 = vector.load %arg3[%c3, %c0_13, %c0_14] : memref<9x64x32xf32, #tpu.memory_space<vmem>>, vector<1x64x32xf32>
    %34 = vector.shape_cast %33 : vector<1x64x32xf32> to vector<64x32xf32>
    %cst_15 = arith.constant dense<0.000000e+00> : vector<256x32xf32>
    %35 = tpu.matmul %9, %34, %cst_15 {dimension_numbers = #tpu.dot_dimension_numbers<[1], [0], [0], [1], [0, 0, 1, 1], [], []>} : vector<256x64xf32>, vector<64x32xf32>, vector<256x32xf32> -> vector<256x32xf32>
    %36 = arith.addf %32, %35 : vector<256x32xf32>
    %c4 = arith.constant 4 : index
    %c0_16 = arith.constant 0 : index
    %c0_17 = arith.constant 0 : index
    %37 = vector.load %arg3[%c4, %c0_16, %c0_17] : memref<9x64x32xf32, #tpu.memory_space<vmem>>, vector<1x64x32xf32>
    %38 = vector.shape_cast %37 : vector<1x64x32xf32> to vector<64x32xf32>
    %cst_18 = arith.constant dense<0.000000e+00> : vector<256x32xf32>
    %39 = tpu.matmul %11, %38, %cst_18 {dimension_numbers = #tpu.dot_dimension_numbers<[1], [0], [0], [1], [0, 0, 1, 1], [], []>} : vector<256x64xf32>, vector<64x32xf32>, vector<256x32xf32> -> vector<256x32xf32>
    %40 = arith.addf %36, %39 : vector<256x32xf32>
    %c5 = arith.constant 5 : index
    %c0_19 = arith.constant 0 : index
    %c0_20 = arith.constant 0 : index
    %41 = vector.load %arg3[%c5, %c0_19, %c0_20] : memref<9x64x32xf32, #tpu.memory_space<vmem>>, vector<1x64x32xf32>
    %42 = vector.shape_cast %41 : vector<1x64x32xf32> to vector<64x32xf32>
    %cst_21 = arith.constant dense<0.000000e+00> : vector<256x32xf32>
    %43 = tpu.matmul %13, %42, %cst_21 {dimension_numbers = #tpu.dot_dimension_numbers<[1], [0], [0], [1], [0, 0, 1, 1], [], []>} : vector<256x64xf32>, vector<64x32xf32>, vector<256x32xf32> -> vector<256x32xf32>
    %44 = arith.addf %40, %43 : vector<256x32xf32>
    %c6 = arith.constant 6 : index
    %c0_22 = arith.constant 0 : index
    %c0_23 = arith.constant 0 : index
    %45 = vector.load %arg3[%c6, %c0_22, %c0_23] : memref<9x64x32xf32, #tpu.memory_space<vmem>>, vector<1x64x32xf32>
    %46 = vector.shape_cast %45 : vector<1x64x32xf32> to vector<64x32xf32>
    %cst_24 = arith.constant dense<0.000000e+00> : vector<256x32xf32>
    %47 = tpu.matmul %15, %46, %cst_24 {dimension_numbers = #tpu.dot_dimension_numbers<[1], [0], [0], [1], [0, 0, 1, 1], [], []>} : vector<256x64xf32>, vector<64x32xf32>, vector<256x32xf32> -> vector<256x32xf32>
    %48 = arith.addf %44, %47 : vector<256x32xf32>
    %c7 = arith.constant 7 : index
    %c0_25 = arith.constant 0 : index
    %c0_26 = arith.constant 0 : index
    %49 = vector.load %arg3[%c7, %c0_25, %c0_26] : memref<9x64x32xf32, #tpu.memory_space<vmem>>, vector<1x64x32xf32>
    %50 = vector.shape_cast %49 : vector<1x64x32xf32> to vector<64x32xf32>
    %cst_27 = arith.constant dense<0.000000e+00> : vector<256x32xf32>
    %51 = tpu.matmul %17, %50, %cst_27 {dimension_numbers = #tpu.dot_dimension_numbers<[1], [0], [0], [1], [0, 0, 1, 1], [], []>} : vector<256x64xf32>, vector<64x32xf32>, vector<256x32xf32> -> vector<256x32xf32>
    %52 = arith.addf %48, %51 : vector<256x32xf32>
    %c8 = arith.constant 8 : index
    %c0_28 = arith.constant 0 : index
    %c0_29 = arith.constant 0 : index
    %53 = vector.load %arg3[%c8, %c0_28, %c0_29] : memref<9x64x32xf32, #tpu.memory_space<vmem>>, vector<1x64x32xf32>
    %54 = vector.shape_cast %53 : vector<1x64x32xf32> to vector<64x32xf32>
    %cst_30 = arith.constant dense<0.000000e+00> : vector<256x32xf32>
    %55 = tpu.matmul %19, %54, %cst_30 {dimension_numbers = #tpu.dot_dimension_numbers<[1], [0], [0], [1], [0, 0, 1, 1], [], []>} : vector<256x64xf32>, vector<64x32xf32>, vector<256x32xf32> -> vector<256x32xf32>
    %56 = arith.addf %52, %55 : vector<256x32xf32>
    %c0_31 = arith.constant 0 : index
    %c0_32 = arith.constant 0 : index
    %57 = vector.load %arg4[%c0_31, %c0_32] : memref<1x32xf32, #tpu.memory_space<vmem>>, vector<1x32xf32>
    %58 = vector.broadcast %57 : vector<1x32xf32> to vector<256x32xf32>
    %59 = arith.addf %56, %58 : vector<256x32xf32>
    %cst_33 = arith.constant 0.000000e+00 : f32
    %60 = vector.broadcast %cst_33 : f32 to vector<256x32xf32>
    %61 = arith.cmpf oge, %59, %60 : vector<256x32xf32>
    %cst_34 = arith.constant 1.000000e-01 : f32
    %62 = vector.broadcast %cst_34 : f32 to vector<256x32xf32>
    %63 = arith.mulf %62, %59 : vector<256x32xf32>
    %64 = arith.select %61, %59, %63 : vector<256x32xi1>, vector<256x32xf32>
    %c0_35 = arith.constant 0 : index
    %c0_36 = arith.constant 0 : index
    %c0_37 = arith.constant 0 : index
    %65 = vector.load %arg5[%c0_35, %c0_36, %c0_37] : memref<1x256x32xf32, #tpu.memory_space<vmem>>, vector<1x256x32xf32>
    %66 = vector.shape_cast %65 : vector<1x256x32xf32> to vector<256x32xf32>
    %67 = vector.shape_cast %64 : vector<256x32xf32> to vector<1x256x32xf32>
    tpu.vector_store %arg5[%c0_35, %c0_36, %c0_37], %67 {strides = array<i32>} : memref<1x256x32xf32, #tpu.memory_space<vmem>>, vector<1x256x32xf32>,
    return
  }
  func.func @transform_0(%arg0: i32, %arg1: i32) -> (i32, i32, i32, i32) {
    %c0_i32 = arith.constant 0 : i32
    %c0_i32_0 = arith.constant 0 : i32
    %c0_i32_1 = arith.constant 0 : i32
    %c0_i32_2 = arith.constant 0 : i32
    return %arg0, %c0_i32, %c0_i32_0, %c0_i32_1 : i32, i32, i32, i32
  }
  func.func @transform_1(%arg0: i32, %arg1: i32) -> (i32, i32, i32) {
    %c0_i32 = arith.constant 0 : i32
    %c0_i32_0 = arith.constant 0 : i32
    %c0_i32_1 = arith.constant 0 : i32
    %c0_i32_2 = arith.constant 0 : i32
    return %c0_i32, %c0_i32_0, %c0_i32_1 : i32, i32, i32
  }
  func.func @transform_2(%arg0: i32, %arg1: i32) -> (i32, i32) {
    %c0_i32 = arith.constant 0 : i32
    %c0_i32_0 = arith.constant 0 : i32
    %c0_i32_1 = arith.constant 0 : i32
    return %c0_i32, %c0_i32_0 : i32, i32
  }
  func.func @transform_3(%arg0: i32, %arg1: i32) -> (i32, i32, i32) {
    %c0_i32 = arith.constant 0 : i32
    %c0_i32_0 = arith.constant 0 : i32
    return %arg0, %arg1, %c0_i32 : i32, i32, i32
  }
}

module attributes {stable_mosaic.version = 11 : i64} {
  func.func @kernel(%arg0: i32, %arg1: i32, %arg2: memref<1x18x18x32xf32, #tpu.memory_space<vmem>>, %arg3: memref<9x32x32xf32, #tpu.memory_space<vmem>>, %arg4: memref<1x32xf32, #tpu.memory_space<vmem>>, %arg5: memref<1x256x32xf32, #tpu.memory_space<vmem>>, %arg6: memref<32x32xf32, #tpu.memory_space<vmem>>, %arg7: memref<1x32xf32, #tpu.memory_space<vmem>>, %arg8: memref<1x256x32xf32, #tpu.memory_space<vmem>>) attributes {dimension_semantics = [#tpu.dimension_semantics<parallel>, #tpu.dimension_semantics<parallel>], iteration_bounds = array<i64: 2, 1>, scalar_prefetch = 0 : i64, scratch_operands = 0 : i64, tpu.core_type = #tpu.core_type<tc>, window_params = [{transform_indices = @transform_0, window_bounds = array<i64: 1, 18, 18, 32>}, {pipeline_mode = #tpu.pipeline_mode<synchronous>, transform_indices = @transform_1, window_bounds = array<i64: 9, 32, 32>}, {pipeline_mode = #tpu.pipeline_mode<synchronous>, transform_indices = @transform_2, window_bounds = array<i64: 1, 32>}, {transform_indices = @transform_3, window_bounds = array<i64: 1, 256, 32>}, {pipeline_mode = #tpu.pipeline_mode<synchronous>, transform_indices = @transform_4, window_bounds = array<i64: 32, 32>}, {pipeline_mode = #tpu.pipeline_mode<synchronous>, transform_indices = @transform_5, window_bounds = array<i64: 1, 32>}, {transform_indices = @transform_6, window_bounds = array<i64: 1, 256, 32>}]} {
    %c0 = arith.constant 0 : index
    %c0_0 = arith.constant 0 : index
    %c0_1 = arith.constant 0 : index
    %c0_2 = arith.constant 0 : index
    %0 = vector.load %arg2[%c0, %c0_0, %c0_1, %c0_2] : memref<1x18x18x32xf32, #tpu.memory_space<vmem>>, vector<1x18x18x32xf32>
    %1 = vector.shape_cast %0 : vector<1x18x18x32xf32> to vector<18x18x32xf32>
    %2 = vector.extract_strided_slice %1 {offsets = [0, 0, 0], sizes = [16, 16, 32], strides = [1, 1, 1]} : vector<18x18x32xf32> to vector<16x16x32xf32>
    %3 = vector.shape_cast %2 : vector<16x16x32xf32> to vector<256x32xf32>
    %4 = vector.extract_strided_slice %1 {offsets = [0, 1, 0], sizes = [16, 16, 32], strides = [1, 1, 1]} : vector<18x18x32xf32> to vector<16x16x32xf32>
    %5 = vector.shape_cast %4 : vector<16x16x32xf32> to vector<256x32xf32>
    %6 = vector.extract_strided_slice %1 {offsets = [0, 2, 0], sizes = [16, 16, 32], strides = [1, 1, 1]} : vector<18x18x32xf32> to vector<16x16x32xf32>
    %7 = vector.shape_cast %6 : vector<16x16x32xf32> to vector<256x32xf32>
    %8 = vector.extract_strided_slice %1 {offsets = [1, 0, 0], sizes = [16, 16, 32], strides = [1, 1, 1]} : vector<18x18x32xf32> to vector<16x16x32xf32>
    %9 = vector.shape_cast %8 : vector<16x16x32xf32> to vector<256x32xf32>
    %10 = vector.extract_strided_slice %1 {offsets = [1, 1, 0], sizes = [16, 16, 32], strides = [1, 1, 1]} : vector<18x18x32xf32> to vector<16x16x32xf32>
    %11 = vector.shape_cast %10 : vector<16x16x32xf32> to vector<256x32xf32>
    %12 = vector.extract_strided_slice %1 {offsets = [1, 2, 0], sizes = [16, 16, 32], strides = [1, 1, 1]} : vector<18x18x32xf32> to vector<16x16x32xf32>
    %13 = vector.shape_cast %12 : vector<16x16x32xf32> to vector<256x32xf32>
    %14 = vector.extract_strided_slice %1 {offsets = [2, 0, 0], sizes = [16, 16, 32], strides = [1, 1, 1]} : vector<18x18x32xf32> to vector<16x16x32xf32>
    %15 = vector.shape_cast %14 : vector<16x16x32xf32> to vector<256x32xf32>
    %16 = vector.extract_strided_slice %1 {offsets = [2, 1, 0], sizes = [16, 16, 32], strides = [1, 1, 1]} : vector<18x18x32xf32> to vector<16x16x32xf32>
    %17 = vector.shape_cast %16 : vector<16x16x32xf32> to vector<256x32xf32>
    %18 = vector.extract_strided_slice %1 {offsets = [2, 2, 0], sizes = [16, 16, 32], strides = [1, 1, 1]} : vector<18x18x32xf32> to vector<16x16x32xf32>
    %19 = vector.shape_cast %18 : vector<16x16x32xf32> to vector<256x32xf32>
    %cst = arith.constant 0.000000e+00 : f32
    %20 = vector.broadcast %cst : f32 to vector<256x32xf32>
    %c0_3 = arith.constant 0 : index
    %c0_4 = arith.constant 0 : index
    %c0_5 = arith.constant 0 : index
    %21 = vector.load %arg3[%c0_3, %c0_4, %c0_5] : memref<9x32x32xf32, #tpu.memory_space<vmem>>, vector<1x32x32xf32>
    %22 = vector.shape_cast %21 : vector<1x32x32xf32> to vector<32x32xf32>
    %cst_6 = arith.constant dense<0.000000e+00> : vector<256x32xf32>
    %23 = tpu.matmul %3, %22, %cst_6 {dimension_numbers = #tpu.dot_dimension_numbers<[1], [0], [0], [1], [0, 0, 1, 1], [], []>} : vector<256x32xf32>, vector<32x32xf32>, vector<256x32xf32> -> vector<256x32xf32>
    %24 = arith.addf %20, %23 : vector<256x32xf32>
    %c1 = arith.constant 1 : index
    %c0_7 = arith.constant 0 : index
    %c0_8 = arith.constant 0 : index
    %25 = vector.load %arg3[%c1, %c0_7, %c0_8] : memref<9x32x32xf32, #tpu.memory_space<vmem>>, vector<1x32x32xf32>
    %26 = vector.shape_cast %25 : vector<1x32x32xf32> to vector<32x32xf32>
    %cst_9 = arith.constant dense<0.000000e+00> : vector<256x32xf32>
    %27 = tpu.matmul %5, %26, %cst_9 {dimension_numbers = #tpu.dot_dimension_numbers<[1], [0], [0], [1], [0, 0, 1, 1], [], []>} : vector<256x32xf32>, vector<32x32xf32>, vector<256x32xf32> -> vector<256x32xf32>
    %28 = arith.addf %24, %27 : vector<256x32xf32>
    %c2 = arith.constant 2 : index
    %c0_10 = arith.constant 0 : index
    %c0_11 = arith.constant 0 : index
    %29 = vector.load %arg3[%c2, %c0_10, %c0_11] : memref<9x32x32xf32, #tpu.memory_space<vmem>>, vector<1x32x32xf32>
    %30 = vector.shape_cast %29 : vector<1x32x32xf32> to vector<32x32xf32>
    %cst_12 = arith.constant dense<0.000000e+00> : vector<256x32xf32>
    %31 = tpu.matmul %7, %30, %cst_12 {dimension_numbers = #tpu.dot_dimension_numbers<[1], [0], [0], [1], [0, 0, 1, 1], [], []>} : vector<256x32xf32>, vector<32x32xf32>, vector<256x32xf32> -> vector<256x32xf32>
    %32 = arith.addf %28, %31 : vector<256x32xf32>
    %c3 = arith.constant 3 : index
    %c0_13 = arith.constant 0 : index
    %c0_14 = arith.constant 0 : index
    %33 = vector.load %arg3[%c3, %c0_13, %c0_14] : memref<9x32x32xf32, #tpu.memory_space<vmem>>, vector<1x32x32xf32>
    %34 = vector.shape_cast %33 : vector<1x32x32xf32> to vector<32x32xf32>
    %cst_15 = arith.constant dense<0.000000e+00> : vector<256x32xf32>
    %35 = tpu.matmul %9, %34, %cst_15 {dimension_numbers = #tpu.dot_dimension_numbers<[1], [0], [0], [1], [0, 0, 1, 1], [], []>} : vector<256x32xf32>, vector<32x32xf32>, vector<256x32xf32> -> vector<256x32xf32>
    %36 = arith.addf %32, %35 : vector<256x32xf32>
    %c4 = arith.constant 4 : index
    %c0_16 = arith.constant 0 : index
    %c0_17 = arith.constant 0 : index
    %37 = vector.load %arg3[%c4, %c0_16, %c0_17] : memref<9x32x32xf32, #tpu.memory_space<vmem>>, vector<1x32x32xf32>
    %38 = vector.shape_cast %37 : vector<1x32x32xf32> to vector<32x32xf32>
    %cst_18 = arith.constant dense<0.000000e+00> : vector<256x32xf32>
    %39 = tpu.matmul %11, %38, %cst_18 {dimension_numbers = #tpu.dot_dimension_numbers<[1], [0], [0], [1], [0, 0, 1, 1], [], []>} : vector<256x32xf32>, vector<32x32xf32>, vector<256x32xf32> -> vector<256x32xf32>
    %40 = arith.addf %36, %39 : vector<256x32xf32>
    %c5 = arith.constant 5 : index
    %c0_19 = arith.constant 0 : index
    %c0_20 = arith.constant 0 : index
    %41 = vector.load %arg3[%c5, %c0_19, %c0_20] : memref<9x32x32xf32, #tpu.memory_space<vmem>>, vector<1x32x32xf32>
    %42 = vector.shape_cast %41 : vector<1x32x32xf32> to vector<32x32xf32>
    %cst_21 = arith.constant dense<0.000000e+00> : vector<256x32xf32>
    %43 = tpu.matmul %13, %42, %cst_21 {dimension_numbers = #tpu.dot_dimension_numbers<[1], [0], [0], [1], [0, 0, 1, 1], [], []>} : vector<256x32xf32>, vector<32x32xf32>, vector<256x32xf32> -> vector<256x32xf32>
    %44 = arith.addf %40, %43 : vector<256x32xf32>
    %c6 = arith.constant 6 : index
    %c0_22 = arith.constant 0 : index
    %c0_23 = arith.constant 0 : index
    %45 = vector.load %arg3[%c6, %c0_22, %c0_23] : memref<9x32x32xf32, #tpu.memory_space<vmem>>, vector<1x32x32xf32>
    %46 = vector.shape_cast %45 : vector<1x32x32xf32> to vector<32x32xf32>
    %cst_24 = arith.constant dense<0.000000e+00> : vector<256x32xf32>
    %47 = tpu.matmul %15, %46, %cst_24 {dimension_numbers = #tpu.dot_dimension_numbers<[1], [0], [0], [1], [0, 0, 1, 1], [], []>} : vector<256x32xf32>, vector<32x32xf32>, vector<256x32xf32> -> vector<256x32xf32>
    %48 = arith.addf %44, %47 : vector<256x32xf32>
    %c7 = arith.constant 7 : index
    %c0_25 = arith.constant 0 : index
    %c0_26 = arith.constant 0 : index
    %49 = vector.load %arg3[%c7, %c0_25, %c0_26] : memref<9x32x32xf32, #tpu.memory_space<vmem>>, vector<1x32x32xf32>
    %50 = vector.shape_cast %49 : vector<1x32x32xf32> to vector<32x32xf32>
    %cst_27 = arith.constant dense<0.000000e+00> : vector<256x32xf32>
    %51 = tpu.matmul %17, %50, %cst_27 {dimension_numbers = #tpu.dot_dimension_numbers<[1], [0], [0], [1], [0, 0, 1, 1], [], []>} : vector<256x32xf32>, vector<32x32xf32>, vector<256x32xf32> -> vector<256x32xf32>
    %52 = arith.addf %48, %51 : vector<256x32xf32>
    %c8 = arith.constant 8 : index
    %c0_28 = arith.constant 0 : index
    %c0_29 = arith.constant 0 : index
    %53 = vector.load %arg3[%c8, %c0_28, %c0_29] : memref<9x32x32xf32, #tpu.memory_space<vmem>>, vector<1x32x32xf32>
    %54 = vector.shape_cast %53 : vector<1x32x32xf32> to vector<32x32xf32>
    %cst_30 = arith.constant dense<0.000000e+00> : vector<256x32xf32>
    %55 = tpu.matmul %19, %54, %cst_30 {dimension_numbers = #tpu.dot_dimension_numbers<[1], [0], [0], [1], [0, 0, 1, 1], [], []>} : vector<256x32xf32>, vector<32x32xf32>, vector<256x32xf32> -> vector<256x32xf32>
    %56 = arith.addf %52, %55 : vector<256x32xf32>
    %c0_31 = arith.constant 0 : index
    %c0_32 = arith.constant 0 : index
    %57 = vector.load %arg4[%c0_31, %c0_32] : memref<1x32xf32, #tpu.memory_space<vmem>>, vector<1x32xf32>
    %58 = vector.broadcast %57 : vector<1x32xf32> to vector<256x32xf32>
    %59 = arith.addf %56, %58 : vector<256x32xf32>
    %c0_33 = arith.constant 0 : index
    %c0_34 = arith.constant 0 : index
    %c0_35 = arith.constant 0 : index
    %60 = vector.load %arg5[%c0_33, %c0_34, %c0_35] : memref<1x256x32xf32, #tpu.memory_space<vmem>>, vector<1x256x32xf32>
    %61 = vector.shape_cast %60 : vector<1x256x32xf32> to vector<256x32xf32>
    %62 = arith.addf %59, %61 : vector<256x32xf32>
    %c0_36 = arith.constant 0 : index
    %c0_37 = arith.constant 0 : index
    %63 = vector.load %arg6[%c0_36, %c0_37] : memref<32x32xf32, #tpu.memory_space<vmem>>, vector<32x32xf32>
    %cst_38 = arith.constant dense<0.000000e+00> : vector<256x32xf32>
    %64 = tpu.matmul %62, %63, %cst_38 {dimension_numbers = #tpu.dot_dimension_numbers<[1], [0], [0], [1], [0, 0, 1, 1], [], []>} : vector<256x32xf32>, vector<32x32xf32>, vector<256x32xf32> -> vector<256x32xf32>
    %c0_39 = arith.constant 0 : index
    %c0_40 = arith.constant 0 : index
    %65 = vector.load %arg7[%c0_39, %c0_40] : memref<1x32xf32, #tpu.memory_space<vmem>>, vector<1x32xf32>
    %66 = vector.broadcast %65 : vector<1x32xf32> to vector<256x32xf32>
    %67 = arith.addf %64, %66 : vector<256x32xf32>
    %cst_41 = arith.constant 0.000000e+00 : f32
    %68 = vector.broadcast %cst_41 : f32 to vector<256x32xf32>
    %69 = arith.cmpf oge, %67, %68 : vector<256x32xf32>
    %cst_42 = arith.constant 1.000000e-01 : f32
    %70 = vector.broadcast %cst_42 : f32 to vector<256x32xf32>
    %71 = arith.mulf %70, %67 : vector<256x32xf32>
    %72 = arith.select %69, %67, %71 : vector<256x32xi1>, vector<256x32xf32>
    %c0_43 = arith.constant 0 : index
    %c0_44 = arith.constant 0 : index
    %c0_45 = arith.constant 0 : index
    %73 = vector.load %arg8[%c0_43, %c0_44, %c0_45] : memref<1x256x32xf32, #tpu.memory_space<vmem>>, vector<1x256x32xf32>
    %74 = vector.shape_cast %73 : vector<1x256x32xf32> to vector<256x32xf32>
    %75 = vector.shape_cast %72 : vector<256x32xf32> to vector<1x256x32xf32>
    tpu.vector_store %arg8[%c0_43, %c0_44, %c0_45], %75 {strides = array<i32>} : memref<1x256x32xf32, #tpu.memory_space<vmem>>, vector<1x256x32xf32>,
    return
  }
  func.func @transform_0(%arg0: i32, %arg1: i32) -> (i32, i32, i32, i32) {
    %c0_i32 = arith.constant 0 : i32
    %c0_i32_0 = arith.constant 0 : i32
    %c0_i32_1 = arith.constant 0 : i32
    %c0_i32_2 = arith.constant 0 : i32
    return %arg0, %c0_i32, %c0_i32_0, %c0_i32_1 : i32, i32, i32, i32
  }
  func.func @transform_1(%arg0: i32, %arg1: i32) -> (i32, i32, i32) {
    %c0_i32 = arith.constant 0 : i32
    %c0_i32_0 = arith.constant 0 : i32
    %c0_i32_1 = arith.constant 0 : i32
    %c0_i32_2 = arith.constant 0 : i32
    return %c0_i32, %c0_i32_0, %c0_i32_1 : i32, i32, i32
  }
  func.func @transform_2(%arg0: i32, %arg1: i32) -> (i32, i32) {
    %c0_i32 = arith.constant 0 : i32
    %c0_i32_0 = arith.constant 0 : i32
    %c0_i32_1 = arith.constant 0 : i32
    return %c0_i32, %c0_i32_0 : i32, i32
  }
  func.func @transform_3(%arg0: i32, %arg1: i32) -> (i32, i32, i32) {
    %c0_i32 = arith.constant 0 : i32
    %c0_i32_0 = arith.constant 0 : i32
    return %arg0, %arg1, %c0_i32 : i32, i32, i32
  }
  func.func @transform_4(%arg0: i32, %arg1: i32) -> (i32, i32) {
    %c0_i32 = arith.constant 0 : i32
    %c0_i32_0 = arith.constant 0 : i32
    %c0_i32_1 = arith.constant 0 : i32
    return %c0_i32, %c0_i32_0 : i32, i32
  }
  func.func @transform_5(%arg0: i32, %arg1: i32) -> (i32, i32) {
    %c0_i32 = arith.constant 0 : i32
    %c0_i32_0 = arith.constant 0 : i32
    %c0_i32_1 = arith.constant 0 : i32
    return %c0_i32, %c0_i32_0 : i32, i32
  }
  func.func @transform_6(%arg0: i32, %arg1: i32) -> (i32, i32, i32) {
    %c0_i32 = arith.constant 0 : i32
    %c0_i32_0 = arith.constant 0 : i32
    return %arg0, %arg1, %c0_i32 : i32, i32, i32
  }
}

</mosaic_0001>

<bundles_post_ra>
// kernel: tile.8
= control target key start
LH: loop header
LB: loop body
LE: loop exit
PB: predicated region body
PF: predicated region fallthrough
CT: control target
= control target key end

     0   :  { %s22_s0 = inlined_call_operand.vmem [shape: f32[32], index: 0, kind: input, shape index: {}]   ;;  %s23_s1 = inlined_call_operand.vmem [shape: f32[3,32], index: 1, kind: output, shape index: {}]  }
   0x1   :  { %v4_v0 = vld [vmem:[%s22_s0] ss:$0 sm:$0xff] }
   0x2   :  { %5 = vst [vmem:[%s23_s1] sm:$0xf] %v4_v0 }

// kernel: tile.9
= control target key start
LH: loop header
LB: loop body
LE: loop exit
PB: predicated region body
PF: predicated region fallthrough
CT: control target
= control target key end

     0   :  { %vm8_vm0 = vcmask 261120   ;;  %s33_s8 = smov 32   ;;  %vm14_vm1 = vcmask 785920   ;;  %vm20_vm2 = vcmask 523520   ;;  %s50_s0 = inlined_call_operand.vmem [shape: f32[3,32], index: 0, kind: input, shape index: {}]   ;;  %s51_s1 = inlined_call_operand.vmem [shape: f32[1,96], index: 1, kind: output, shape index: {}]  }
   0x1   :  { %v5_v0 = vld [vmem:[%s50_s0] sm:$0xf]  ;;  %s32_s0 = smov 64  }
   0x2   :  { %6 = vst [vmem:[#allocation1] sm:$0xf] %v5_v0 }
   0x9   :  { %v11_v1 = vld [vmem:[#allocation1 + $0x2] sm:$0x1]   ;;  %v7_v2 = vld [vmem:[#allocation1] sm:$0x1]   ;;  %v17_v3 = vld [vmem:[#allocation1 + $0x1] sm:$0x1]  }
   0xa   :  { %12 = vrot.lane.b32.xlu0 %v11_v1, %s32_s0  ;;  %9 = vst.msk [vmem:[#allocation0] sm:$0x1] %vm8_vm0, %v7_v2  }
   0xe   :  { %18 = vrot.lane.b32.xlu0 %v17_v3, %s33_s8 }
  0x7c   :  { %v13_v4 = vpop.permute.xlu0 %12  }
  0x7d   :  { %15 = vst.msk [vmem:[#allocation0] sm:$0x1] %vm14_vm1, %v13_v4  }
  0x80   :  { %v19_v5 = vpop.permute.xlu0 %18  }
  0x81   :  { %21 = vst.msk [vmem:[#allocation0] sm:$0x1] %vm20_vm2, %v19_v5  }
  0x88   :  { %v26_v6 = vld [vmem:[#allocation0] sm:$0x1] }
  0x89   :  { %29 = vst [vmem:[%s51_s1] sm:$0x1] %v26_v6 }

// kernel: tile.8
= control target key start
LH: loop header
LB: loop body
LE: loop exit
PB: predicated region body
PF: predicated region fallthrough
CT: control target
= control target key end

     0   :  { %s22_s0 = inlined_call_operand.vmem [shape: f32[32], index: 0, kind: input, shape index: {}]   ;;  %s23_s1 = inlined_call_operand.vmem [shape: f32[3,32], index: 1, kind: output, shape index: {}]  }
   0x1   :  { %v4_v0 = vld [vmem:[%s22_s0] ss:$0 sm:$0xff] }
   0x2   :  { %5 = vst [vmem:[%s23_s1] sm:$0xf] %v4_v0 }

// kernel: tile.9
= control target key start
LH: loop header
LB: loop body
LE: loop exit
PB: predicated region body
PF: predicated region fallthrough
CT: control target
= control target key end

     0   :  { %vm8_vm0 = vcmask 261120   ;;  %s33_s8 = smov 32   ;;  %vm14_vm1 = vcmask 785920   ;;  %vm20_vm2 = vcmask 523520   ;;  %s50_s0 = inlined_call_operand.vmem [shape: f32[3,32], index: 0, kind: input, shape index: {}]   ;;  %s51_s1 = inlined_call_operand.vmem [shape: f32[1,96], index: 1, kind: output, shape index: {}]  }
   0x1   :  { %v5_v0 = vld [vmem:[%s50_s0] sm:$0xf]  ;;  %s32_s0 = smov 64  }
   0x2   :  { %6 = vst [vmem:[#allocation1] sm:$0xf] %v5_v0 }
   0x9   :  { %v11_v1 = vld [vmem:[#allocation1 + $0x2] sm:$0x1]   ;;  %v7_v2 = vld [vmem:[#allocation1] sm:$0x1]   ;;  %v17_v3 = vld [vmem:[#allocation1 + $0x1] sm:$0x1]  }
   0xa   :  { %12 = vrot.lane.b32.xlu0 %v11_v1, %s32_s0  ;;  %9 = vst.msk [vmem:[#allocation0] sm:$0x1] %vm8_vm0, %v7_v2  }
   0xe   :  { %18 = vrot.lane.b32.xlu0 %v17_v3, %s33_s8 }
  0x7c   :  { %v13_v4 = vpop.permute.xlu0 %12  }
  0x7d   :  { %15 = vst.msk [vmem:[#allocation0] sm:$0x1] %vm14_vm1, %v13_v4  }
  0x80   :  { %v19_v5 = vpop.permute.xlu0 %18  }
  0x81   :  { %21 = vst.msk [vmem:[#allocation0] sm:$0x1] %vm20_vm2, %v19_v5  }
  0x88   :  { %v26_v6 = vld [vmem:[#allocation0] sm:$0x1] }
  0x89   :  { %29 = vst [vmem:[%s51_s1] sm:$0x1] %v26_v6 }

</bundles_post_ra>
